<compile_context>
chip_gen: v7x
topology: tpu7x:2x2x1
jax: 0.10.0
libtpu: 0.0.40
codegen_flags: <defaults>
</compile_context>

<pallas_src>
import functools

import jax
import jax.numpy as jnp
import numpy as np
from jax import lax
from jax.experimental import pallas as pl
from jax.experimental.pallas import tpu as pltpu

PAD_IDX = 0
LANE = 128


def _round_up(x, m):
    return ((x + m - 1) // m) * m


# ----------------------------------------------------------------------------
# Pallas kernel
# ----------------------------------------------------------------------------
def make_lstm_classifier_kernel(*, num_layers, seq_len, emb_pad, hidden_pad, tile_b):
    T, Ep, Hp, TB = seq_len, emb_pad, hidden_pad, tile_b

    def kernel(*refs):
        # scalar prefetch, inputs, output, scratch
        ml_ref = refs[0]                          # SMEM (num_tiles,) per-tile max length
        emb_ref = refs[1]                         # VMEM (T, TB, Ep) bf16, time-major
        len_ref = refs[2]                         # VMEM (TB, 1) int32
        layer_refs = refs[3:3 + 3 * num_layers]   # (w_ih, w_hh, b) * L
        fc_w_ref = refs[3 + 3 * num_layers]       # (1, Hp) f32
        fc_b_ref = refs[4 + 3 * num_layers]       # (1, 1) f32
        out_ref = refs[5 + 3 * num_layers]        # (TB, 1) f32
        xg_ref = refs[6 + 3 * num_layers]         # VMEM (T, TB, 4*Hp) f32 scratch
        lo_ref = refs[7 + 3 * num_layers] if num_layers > 1 else None  # (T, TB, Hp) bf16

        max_len = ml_ref[pl.program_id(0)]        # bounds the recurrence for this tile
        lens = len_ref[...]                       # (TB, 1) int32, read once per grid step

        h = jnp.zeros((TB, Hp), jnp.float32)
        for l in range(num_layers):
            w_ih_ref = layer_refs[3 * l]          # (in_p, 4*Hp) bf16
            w_hh_ref = layer_refs[3 * l + 1]      # (Hp, 4*Hp) bf16
            b = layer_refs[3 * l + 2][...]        # (1, 4*Hp) f32  (b_ih + b_hh)

            # Hoisted input-to-hidden matmul for ALL timesteps at once (one MXU-shaped
            # matmul per layer), bias folded in; result parked in VMEM scratch.
            if l == 0:
                x_all = emb_ref[...].reshape(T * TB, Ep)            # bf16
            else:
                x_all = lo_ref[...].reshape(T * TB, Hp)             # bf16 already
            xg_ref[...] = (
                jnp.dot(x_all, w_ih_ref[...], preferred_element_type=jnp.float32) + b
            ).reshape(T, TB, 4 * Hp)

            is_last = (l == num_layers - 1)

            def step(t, carry, _is_last=is_last):
                h, c = carry
                gates = xg_ref[t] + jnp.dot(
                    h.astype(jnp.bfloat16), w_hh_ref[...],
                    preferred_element_type=jnp.float32)             # (TB, 4*Hp)
                # PyTorch gate order [i, f, g, o]; each gate is a full 128-lane block.
                i_g = jax.nn.sigmoid(gates[:, 0:Hp])
                f_g = jax.nn.sigmoid(gates[:, Hp:2 * Hp])
                g_g = jnp.tanh(gates[:, 2 * Hp:3 * Hp])
                o_g = jax.nn.sigmoid(gates[:, 3 * Hp:4 * Hp])
                c_new = f_g * c + i_g * g_g
                h_new = o_g * jnp.tanh(c_new)
                keep = t < lens                   # packed-sequence freeze per row
                h = jnp.where(keep, h_new, h)
                c = jnp.where(keep, c_new, c)
                if not _is_last:
                    lo_ref[t] = h.astype(jnp.bfloat16)   # feed next layer (time-major)
                return h, c

            h, _ = lax.fori_loop(
                0, max_len, step,
                (jnp.zeros((TB, Hp), jnp.float32), jnp.zeros((TB, Hp), jnp.float32)))
            # TODO(synk): inter-layer LSTM dropout / nn.Dropout are identity in eval mode;
            #             training-mode stochastic dropout not implemented.

        # hidden[-1] -> fc -> sigmoid as a VPU row-reduce (skip an N=1 MXU pass).
        logits = jnp.sum(h * fc_w_ref[...], axis=-1, keepdims=True) + fc_b_ref[...]
        out_ref[...] = jax.nn.sigmoid(logits)     # (TB, 1)

    return kernel


# ----------------------------------------------------------------------------
# Parameter packing (raw PyTorch layout -> padded, transposed, per-gate blocks)
# ----------------------------------------------------------------------------
def _pack_gate_w(w, in_p, H, Hp):
    # w: (4H, in_dim) PyTorch layout -> (in_p, 4*Hp) bf16 with gate g at cols [g*Hp, g*Hp+H)
    in_dim = w.shape[1]
    wt = w.T
    out = jnp.zeros((in_p, 4 * Hp), jnp.float32)
    for g in range(4):
        out = out.at[:in_dim, g * Hp:g * Hp + H].set(wt[:, g * H:(g + 1) * H])
    return out.astype(jnp.bfloat16)


def _pack_gate_b(b, H, Hp):
    out = jnp.zeros((1, 4 * Hp), jnp.float32)
    for g in range(4):
        out = out.at[0, g * Hp:g * Hp + H].set(b[g * H:(g + 1) * H])
    return out


def pack_params(params):
    H, E = params["hidden_dim"], params["embed_dim"]
    Hp, Ep = _round_up(H, LANE), _round_up(E, LANE)
    layers = []
    for l, layer in enumerate(params["layers"]):
        in_p = Ep if l == 0 else Hp
        layers.append((_pack_gate_w(layer["w_ih"], in_p, H, Hp),
                       _pack_gate_w(layer["w_hh"], Hp, H, Hp),
                       _pack_gate_b(layer["b"], H, Hp)))
    fc_w = jnp.zeros((1, Hp), jnp.float32).at[:, :H].set(params["fc_w"])
    fc_b = params["fc_b"].reshape(1, 1).astype(jnp.float32)
    return {"layers": layers, "fc_w": fc_w, "fc_b": fc_b, "Hp": Hp, "Ep": Ep}


# ----------------------------------------------------------------------------
# Wrapper
# ----------------------------------------------------------------------------
def lstm_classifier_forward(tokens, lengths, params, *, tile_b=8):
    # NOTE: at realistic batch sizes raise tile_b (e.g. ~128) within the per-generation
    # VMEM budget (64 MiB on v7x, 128 MiB on v5e/v6e); tile_b must be a multiple of 8.
    B, T = tokens.shape
    E = params["embed_dim"]
    num_layers = len(params["layers"])

    packed = pack_params(params)
    Hp, Ep = packed["Hp"], packed["Ep"]

    B_pad = _round_up(B, tile_b)
    num_tiles = B_pad // tile_b

    tok_p = jnp.full((B_pad, T), PAD_IDX, dtype=tokens.dtype).at[:B].set(tokens)
    len_p = jnp.zeros((B_pad,), jnp.int32).at[:B].set(lengths.astype(jnp.int32))

    # TODO(synk): embedding gather could be fused into the kernel via scalar-prefetched
    #             token ids + per-row DMA; kept in JAX here.
    emb = jnp.take(params["embedding"], tok_p, axis=0)     # (B_pad, T, E), row 0 is zeros
    emb = jnp.transpose(emb, (1, 0, 2))                    # time-major (T, B_pad, E)
    emb = jnp.pad(emb, ((0, 0), (0, 0), (0, Ep - E))).astype(jnp.bfloat16)

    # Per-batch-tile max length (scalar-prefetched; bounds the recurrence trip count).
    tile_max_len = jnp.max(len_p.reshape(num_tiles, tile_b), axis=1).astype(jnp.int32)

    const2 = lambda i, ml: (0, 0)
    inputs = [emb, len_p.reshape(B_pad, 1)]
    in_specs = [
        pl.BlockSpec((T, tile_b, Ep), lambda i, ml: (0, i, 0)),
        pl.BlockSpec((tile_b, 1), lambda i, ml: (i, 0)),
    ]
    for (w_ih, w_hh, b) in packed["layers"]:
        inputs += [w_ih, w_hh, b]
        in_specs += [pl.BlockSpec(w_ih.shape, const2),
                     pl.BlockSpec(w_hh.shape, const2),
                     pl.BlockSpec(b.shape, const2)]
    inputs += [packed["fc_w"], packed["fc_b"]]
    in_specs += [pl.BlockSpec(packed["fc_w"].shape, const2),
                 pl.BlockSpec(packed["fc_b"].shape, const2)]

    scratch_shapes = [pltpu.VMEM((T, tile_b, 4 * Hp), jnp.float32)]    # hoisted x-gates
    if num_layers > 1:
        scratch_shapes.append(pltpu.VMEM((T, tile_b, Hp), jnp.bfloat16))  # layer outputs

    kernel = make_lstm_classifier_kernel(
        num_layers=num_layers, seq_len=T, emb_pad=Ep, hidden_pad=Hp, tile_b=tile_b)

    out = pl.pallas_call(
        kernel,
        out_shape=jax.ShapeDtypeStruct((B_pad, 1), jnp.float32),
        grid_spec=pltpu.PrefetchScalarGridSpec(
            num_scalar_prefetch=1,
            grid=(num_tiles,),
            in_specs=in_specs,
            out_specs=pl.BlockSpec((tile_b, 1), lambda i, ml: (i, 0)),
            scratch_shapes=scratch_shapes),
        compiler_params=pltpu.CompilerParams(
            dimension_semantics=("parallel",),
            vmem_limit_bytes=48 * 1024 * 1024),
    )(tile_max_len, *inputs)

    return out[:B, 0]                                       # squeeze(1) -> (B,)


# ----------------------------------------------------------------------------
# Pure-JAX reference (f32, raw PyTorch-layout params) for correctness check
# ----------------------------------------------------------------------------
def reference_forward(tokens, lengths, params):
    emb = jnp.take(params["embedding"], tokens, axis=0)
    B, T, _ = emb.shape
    H = params["hidden_dim"]
    lens = lengths.reshape(B, 1)
    xs = [emb[:, t, :] for t in range(T)]
    h = None
    for layer in params["layers"]:
        w_ih, w_hh, b = layer["w_ih"].T, layer["w_hh"].T, layer["b"][None, :]
        h = jnp.zeros((B, H), jnp.float32)
        c = jnp.zeros((B, H), jnp.float32)
        outs = []
        for t in range(T):
            g = xs[t] @ w_ih + h @ w_hh + b
            i_g = jax.nn.sigmoid(g[:, 0:H]); f_g = jax.nn.sigmoid(g[:, H:2 * H])
            g_g = jnp.tanh(g[:, 2 * H:3 * H]); o_g = jax.nn.sigmoid(g[:, 3 * H:4 * H])
            c_new = f_g * c + i_g * g_g
            h_new = o_g * jnp.tanh(c_new)
            m = t < lens
            h = jnp.where(m, h_new, h); c = jnp.where(m, c_new, c)
            outs.append(h)
        xs = outs
    return jax.nn.sigmoid(h @ params["fc_w"].T + params["fc_b"])[:, 0]


# ----------------------------------------------------------------------------
# Deterministic parameter init (raw shapes per LSTMClassifier.__init__)
# ----------------------------------------------------------------------------
def init_params(key, vocab_size, embed_dim, hidden_dim, num_layers):
    H = hidden_dim
    bound = 1.0 / np.sqrt(H)
    keys = jax.random.split(key, 1 + 4 * num_layers + 2)

    emb = jax.random.normal(keys[0], (vocab_size, embed_dim), jnp.float32) * 0.1
    emb = emb.at[PAD_IDX].set(0.0)                           # padding_idx=0 -> zero row

    layers = []
    kidx = 1
    for l in range(num_layers):
        in_dim = embed_dim if l == 0 else H
        w_ih = jax.random.uniform(keys[kidx], (4 * H, in_dim), jnp.float32, -bound, bound)
        w_hh = jax.random.uniform(keys[kidx + 1], (4 * H, H), jnp.float32, -bound, bound)
        b_ih = jax.random.uniform(keys[kidx + 2], (4 * H,), jnp.float32, -bound, bound)
        b_hh = jax.random.uniform(keys[kidx + 3], (4 * H,), jnp.float32, -bound, bound)
        kidx += 4
        layers.append({"w_ih": w_ih, "w_hh": w_hh, "b": b_ih + b_hh})

    fc_w = jax.random.uniform(keys[kidx], (1, H), jnp.float32, -bound, bound)
    fc_b = jax.random.uniform(keys[kidx + 1], (1,), jnp.float32, -bound, bound)

    return {"embedding": emb, "layers": layers, "fc_w": fc_w, "fc_b": fc_b,
            "hidden_dim": H, "embed_dim": embed_dim}


# ----------------------------------------------------------------------------
if __name__ == "__main__":
    vocab_size, embed_dim, hidden_dim, num_layers = 50, 16, 32, 2
    B, T = 2, 8

    key = jax.random.PRNGKey(0)
    pkey, tkey = jax.random.split(key)
    params = init_params(pkey, vocab_size, embed_dim, hidden_dim, num_layers)

    lengths = jnp.array([8, 5], dtype=jnp.int32)
    tokens = jax.random.randint(tkey, (B, T), 1, vocab_size, dtype=jnp.int32)
    tokens = jnp.where(jnp.arange(T)[None, :] < lengths[:, None], tokens, PAD_IDX)

    out = lstm_classifier_forward(tokens, lengths, params)
    out = jax.block_until_ready(out)

    ref = reference_forward(tokens, lengths, params)
    np.testing.assert_allclose(np.asarray(out), np.asarray(ref), atol=2e-2, rtol=2e-2)
    assert out.shape == (B,)

    print("KERNEL_OK")
</pallas_src>

<mosaic_0001>
module attributes {stable_mosaic.version = 11 : i64} {
  func.func @kernel(%arg0: i32, %arg1: memref<1xi32, #tpu.memory_space<smem>>, %arg2: memref<8x8x128xbf16, #tpu.memory_space<vmem>>, %arg3: memref<8x1xi32, #tpu.memory_space<vmem>>, %arg4: memref<128x512xbf16, #tpu.memory_space<vmem>>, %arg5: memref<128x512xbf16, #tpu.memory_space<vmem>>, %arg6: memref<1x512xf32, #tpu.memory_space<vmem>>, %arg7: memref<128x512xbf16, #tpu.memory_space<vmem>>, %arg8: memref<128x512xbf16, #tpu.memory_space<vmem>>, %arg9: memref<1x512xf32, #tpu.memory_space<vmem>>, %arg10: memref<1x128xf32, #tpu.memory_space<vmem>>, %arg11: memref<1x1xf32, #tpu.memory_space<vmem>>, %arg12: memref<8x1xf32, #tpu.memory_space<vmem>>, %arg13: memref<8x8x512xf32, #tpu.memory_space<vmem>>, %arg14: memref<8x8x128xbf16, #tpu.memory_space<vmem>>) attributes {dimension_semantics = [#tpu.dimension_semantics<parallel>], iteration_bounds = array<i64: 1>, scalar_prefetch = 1 : i64, scratch_operands = 2 : i64, tpu.core_type = #tpu.core_type<tc>, window_params = [{transform_indices = @transform_0, window_bounds = array<i64: 8, 8, 128>}, {transform_indices = @transform_1, window_bounds = array<i64: 8, 1>}, {pipeline_mode = #tpu.pipeline_mode<synchronous>, transform_indices = @transform_2, window_bounds = array<i64: 128, 512>}, {pipeline_mode = #tpu.pipeline_mode<synchronous>, transform_indices = @transform_3, window_bounds = array<i64: 128, 512>}, {pipeline_mode = #tpu.pipeline_mode<synchronous>, transform_indices = @transform_4, window_bounds = array<i64: 1, 512>}, {pipeline_mode = #tpu.pipeline_mode<synchronous>, transform_indices = @transform_5, window_bounds = array<i64: 128, 512>}, {pipeline_mode = #tpu.pipeline_mode<synchronous>, transform_indices = @transform_6, window_bounds = array<i64: 128, 512>}, {pipeline_mode = #tpu.pipeline_mode<synchronous>, transform_indices = @transform_7, window_bounds = array<i64: 1, 512>}, {pipeline_mode = #tpu.pipeline_mode<synchronous>, transform_indices = @transform_8, window_bounds = array<i64: 1, 128>}, {pipeline_mode = #tpu.pipeline_mode<synchronous>, transform_indices = @transform_9, window_bounds = array<i64: 1, 1>}, {transform_indices = @transform_10, window_bounds = array<i64: 8, 1>}]} {
    %0 = arith.index_cast %arg0 : i32 to index
    %1 = memref.load %arg1[%0] : memref<1xi32, #tpu.memory_space<smem>>
    %c0 = arith.constant 0 : index
    %c0_0 = arith.constant 0 : index
    %2 = vector.load %arg3[%c0, %c0_0] : memref<8x1xi32, #tpu.memory_space<vmem>>, vector<8x1xi32>
    %c0_1 = arith.constant 0 : index
    %c0_2 = arith.constant 0 : index
    %3 = vector.load %arg6[%c0_1, %c0_2] : memref<1x512xf32, #tpu.memory_space<vmem>>, vector<1x512xf32>
    %c0_3 = arith.constant 0 : index
    %c0_4 = arith.constant 0 : index
    %c0_5 = arith.constant 0 : index
    %4 = vector.load %arg2[%c0_3, %c0_4, %c0_5] : memref<8x8x128xbf16, #tpu.memory_space<vmem>>, vector<8x8x128xbf16>
    %5 = vector.shape_cast %4 : vector<8x8x128xbf16> to vector<64x128xbf16>
    %c0_6 = arith.constant 0 : index
    %c0_7 = arith.constant 0 : index
    %6 = vector.load %arg4[%c0_6, %c0_7] : memref<128x512xbf16, #tpu.memory_space<vmem>>, vector<128x512xbf16>
    %cst = arith.constant dense<0.000000e+00> : vector<64x512xf32>
    %7 = tpu.matmul %5, %6, %cst {dimension_numbers = #tpu.dot_dimension_numbers<[1], [0], [0], [1], [0, 0, 1, 1], [], []>} : vector<64x128xbf16>, vector<128x512xbf16>, vector<64x512xf32> -> vector<64x512xf32>
    %8 = vector.broadcast %3 : vector<1x512xf32> to vector<64x512xf32>
    %9 = arith.addf %7, %8 : vector<64x512xf32>
    %10 = vector.shape_cast %9 : vector<64x512xf32> to vector<8x8x512xf32>
    %c0_8 = arith.constant 0 : index
    %c0_9 = arith.constant 0 : index
    %c0_10 = arith.constant 0 : index
    %11 = vector.load %arg13[%c0_8, %c0_9, %c0_10] : memref<8x8x512xf32, #tpu.memory_space<vmem>>, vector<8x8x512xf32>
    tpu.vector_store %arg13[%c0_8, %c0_9, %c0_10], %10 {strides = array<i32>} : memref<8x8x512xf32, #tpu.memory_space<vmem>>, vector<8x8x512xf32>,
    %cst_11 = arith.constant 0.000000e+00 : f32
    %12 = vector.broadcast %cst_11 : f32 to vector<8x128xf32>
    %cst_12 = arith.constant 0.000000e+00 : f32
    %13 = vector.broadcast %cst_12 : f32 to vector<8x128xf32>
    %c0_i32 = arith.constant 0 : i32
    %14 = arith.subi %1, %c0_i32 : i32
    %15 = arith.addi %c0_i32, %14 : i32
    %c1_i32 = arith.constant 1 : i32
    %16:2 = scf.for %arg15 = %c0_i32 to %15 step %c1_i32 iter_args(%arg16 = %12, %arg17 = %13) -> (vector<8x128xf32>, vector<8x128xf32>)  : i32 {
      %45 = arith.index_cast %arg15 : i32 to index
      %c0_36 = arith.constant 0 : index
      %c0_37 = arith.constant 0 : index
      %46 = vector.load %arg13[%45, %c0_36, %c0_37] : memref<8x8x512xf32, #tpu.memory_space<vmem>>, vector<1x8x512xf32>
      %47 = vector.shape_cast %46 : vector<1x8x512xf32> to vector<8x512xf32>
      %48 = arith.truncf %arg16 : vector<8x128xf32> to vector<8x128xbf16>
      %c0_38 = arith.constant 0 : index
      %c0_39 = arith.constant 0 : index
      %49 = vector.load %arg5[%c0_38, %c0_39] : memref<128x512xbf16, #tpu.memory_space<vmem>>, vector<128x512xbf16>
      %cst_40 = arith.constant dense<0.000000e+00> : vector<8x512xf32>
      %50 = tpu.matmul %48, %49, %cst_40 {dimension_numbers = #tpu.dot_dimension_numbers<[1], [0], [0], [1], [0, 0, 1, 1], [], []>} : vector<8x128xbf16>, vector<128x512xbf16>, vector<8x512xf32> -> vector<8x512xf32>
      %51 = arith.addf %47, %50 : vector<8x512xf32>
      %52 = vector.extract_strided_slice %51 {offsets = [0, 0], sizes = [8, 128], strides = [1, 1]} : vector<8x512xf32> to vector<8x128xf32>
      %53 = arith.negf %52 : vector<8x128xf32>
      %54 = math.exp %53 : vector<8x128xf32>
      %cst_41 = arith.constant 1.000000e+00 : f32
      %55 = vector.broadcast %cst_41 : f32 to vector<8x128xf32>
      %56 = arith.addf %55, %54 : vector<8x128xf32>
      %57 = arith.divf %55, %56 : vector<8x128xf32>
      %58 = vector.extract_strided_slice %51 {offsets = [0, 128], sizes = [8, 128], strides = [1, 1]} : vector<8x512xf32> to vector<8x128xf32>
      %59 = arith.negf %58 : vector<8x128xf32>
      %60 = math.exp %59 : vector<8x128xf32>
      %cst_42 = arith.constant 1.000000e+00 : f32
      %61 = vector.broadcast %cst_42 : f32 to vector<8x128xf32>
      %62 = arith.addf %61, %60 : vector<8x128xf32>
      %63 = arith.divf %61, %62 : vector<8x128xf32>
      %64 = vector.extract_strided_slice %51 {offsets = [0, 256], sizes = [8, 128], strides = [1, 1]} : vector<8x512xf32> to vector<8x128xf32>
      %65 = math.tanh %64 : vector<8x128xf32>
      %66 = vector.extract_strided_slice %51 {offsets = [0, 384], sizes = [8, 128], strides = [1, 1]} : vector<8x512xf32> to vector<8x128xf32>
      %67 = arith.negf %66 : vector<8x128xf32>
      %68 = math.exp %67 : vector<8x128xf32>
      %cst_43 = arith.constant 1.000000e+00 : f32
      %69 = vector.broadcast %cst_43 : f32 to vector<8x128xf32>
      %70 = arith.addf %69, %68 : vector<8x128xf32>
      %71 = arith.divf %69, %70 : vector<8x128xf32>
      %72 = arith.mulf %63, %arg17 : vector<8x128xf32>
      %73 = arith.mulf %57, %65 : vector<8x128xf32>
      %74 = arith.addf %72, %73 : vector<8x128xf32>
      %75 = math.tanh %74 : vector<8x128xf32>
      %76 = arith.mulf %71, %75 : vector<8x128xf32>
      %77 = vector.broadcast %arg15 : i32 to vector<8x1xi32>
      %78 = arith.cmpi slt, %77, %2 : vector<8x1xi32>
      %79 = vector.shape_cast %78 : vector<8x1xi1> to vector<8x1xi1>
      %80 = vector.broadcast %79 : vector<8x1xi1> to vector<8x128xi1>
      %81 = arith.select %80, %76, %arg16 : vector<8x128xi1>, vector<8x128xf32>
      %82 = vector.shape_cast %78 : vector<8x1xi1> to vector<8x1xi1>
      %83 = vector.broadcast %82 : vector<8x1xi1> to vector<8x128xi1>
      %84 = arith.select %83, %74, %arg17 : vector<8x128xi1>, vector<8x128xf32>
      %85 = arith.truncf %81 : vector<8x128xf32> to vector<8x128xbf16>
      %86 = arith.index_cast %arg15 : i32 to index
      %c0_44 = arith.constant 0 : index
      %c0_45 = arith.constant 0 : index
      %87 = vector.load %arg14[%86, %c0_44, %c0_45] : memref<8x8x128xbf16, #tpu.memory_space<vmem>>, vector<1x8x128xbf16>
      %88 = vector.shape_cast %87 : vector<1x8x128xbf16> to vector<8x128xbf16>
      %89 = vector.shape_cast %85 : vector<8x128xbf16> to vector<1x8x128xbf16>
      tpu.vector_store %arg14[%86, %c0_44, %c0_45], %89 {strides = array<i32>} : memref<8x8x128xbf16, #tpu.memory_space<vmem>>, vector<1x8x128xbf16>,
      scf.yield %81, %84 : vector<8x128xf32>, vector<8x128xf32>
    }
    %c0_13 = arith.constant 0 : index
    %c0_14 = arith.constant 0 : index
    %17 = vector.load %arg9[%c0_13, %c0_14] : memref<1x512xf32, #tpu.memory_space<vmem>>, vector<1x512xf32>
    %c0_15 = arith.constant 0 : index
    %c0_16 = arith.constant 0 : index
    %c0_17 = arith.constant 0 : index
    %18 = vector.load %arg14[%c0_15, %c0_16, %c0_17] : memref<8x8x128xbf16, #tpu.memory_space<vmem>>, vector<8x8x128xbf16>
    %19 = vector.shape_cast %18 : vector<8x8x128xbf16> to vector<64x128xbf16>
    %c0_18 = arith.constant 0 : index
    %c0_19 = arith.constant 0 : index
    %20 = vector.load %arg7[%c0_18, %c0_19] : memref<128x512xbf16, #tpu.memory_space<vmem>>, vector<128x512xbf16>
    %cst_20 = arith.constant dense<0.000000e+00> : vector<64x512xf32>
    %21 = tpu.matmul %19, %20, %cst_20 {dimension_numbers = #tpu.dot_dimension_numbers<[1], [0], [0], [1], [0, 0, 1, 1], [], []>} : vector<64x128xbf16>, vector<128x512xbf16>, vector<64x512xf32> -> vector<64x512xf32>
    %22 = vector.broadcast %17 : vector<1x512xf32> to vector<64x512xf32>
    %23 = arith.addf %21, %22 : vector<64x512xf32>
    %24 = vector.shape_cast %23 : vector<64x512xf32> to vector<8x8x512xf32>
    %c0_21 = arith.constant 0 : index
    %c0_22 = arith.constant 0 : index
    %c0_23 = arith.constant 0 : index
    %25 = vector.load %arg13[%c0_21, %c0_22, %c0_23] : memref<8x8x512xf32, #tpu.memory_space<vmem>>, vector<8x8x512xf32>
    tpu.vector_store %arg13[%c0_21, %c0_22, %c0_23], %24 {strides = array<i32>} : memref<8x8x512xf32, #tpu.memory_space<vmem>>, vector<8x8x512xf32>,
    %cst_24 = arith.constant 0.000000e+00 : f32
    %26 = vector.broadcast %cst_24 : f32 to vector<8x128xf32>
    %cst_25 = arith.constant 0.000000e+00 : f32
    %27 = vector.broadcast %cst_25 : f32 to vector<8x128xf32>
    %c0_i32_26 = arith.constant 0 : i32
    %28 = arith.subi %1, %c0_i32_26 : i32
    %29 = arith.addi %c0_i32_26, %28 : i32
    %c1_i32_27 = arith.constant 1 : i32
    %30:2 = scf.for %arg15 = %c0_i32_26 to %29 step %c1_i32_27 iter_args(%arg16 = %26, %arg17 = %27) -> (vector<8x128xf32>, vector<8x128xf32>)  : i32 {
      %45 = arith.index_cast %arg15 : i32 to index
      %c0_36 = arith.constant 0 : index
      %c0_37 = arith.constant 0 : index
      %46 = vector.load %arg13[%45, %c0_36, %c0_37] : memref<8x8x512xf32, #tpu.memory_space<vmem>>, vector<1x8x512xf32>
      %47 = vector.shape_cast %46 : vector<1x8x512xf32> to vector<8x512xf32>
      %48 = arith.truncf %arg16 : vector<8x128xf32> to vector<8x128xbf16>
      %c0_38 = arith.constant 0 : index
      %c0_39 = arith.constant 0 : index
      %49 = vector.load %arg8[%c0_38, %c0_39] : memref<128x512xbf16, #tpu.memory_space<vmem>>, vector<128x512xbf16>
      %cst_40 = arith.constant dense<0.000000e+00> : vector<8x512xf32>
      %50 = tpu.matmul %48, %49, %cst_40 {dimension_numbers = #tpu.dot_dimension_numbers<[1], [0], [0], [1], [0, 0, 1, 1], [], []>} : vector<8x128xbf16>, vector<128x512xbf16>, vector<8x512xf32> -> vector<8x512xf32>
      %51 = arith.addf %47, %50 : vector<8x512xf32>
      %52 = vector.extract_strided_slice %51 {offsets = [0, 0], sizes = [8, 128], strides = [1, 1]} : vector<8x512xf32> to vector<8x128xf32>
      %53 = arith.negf %52 : vector<8x128xf32>
      %54 = math.exp %53 : vector<8x128xf32>
      %cst_41 = arith.constant 1.000000e+00 : f32
      %55 = vector.broadcast %cst_41 : f32 to vector<8x128xf32>
      %56 = arith.addf %55, %54 : vector<8x128xf32>
      %57 = arith.divf %55, %56 : vector<8x128xf32>
      %58 = vector.extract_strided_slice %51 {offsets = [0, 128], sizes = [8, 128], strides = [1, 1]} : vector<8x512xf32> to vector<8x128xf32>
      %59 = arith.negf %58 : vector<8x128xf32>
      %60 = math.exp %59 : vector<8x128xf32>
      %cst_42 = arith.constant 1.000000e+00 : f32
      %61 = vector.broadcast %cst_42 : f32 to vector<8x128xf32>
      %62 = arith.addf %61, %60 : vector<8x128xf32>
      %63 = arith.divf %61, %62 : vector<8x128xf32>
      %64 = vector.extract_strided_slice %51 {offsets = [0, 256], sizes = [8, 128], strides = [1, 1]} : vector<8x512xf32> to vector<8x128xf32>
      %65 = math.tanh %64 : vector<8x128xf32>
      %66 = vector.extract_strided_slice %51 {offsets = [0, 384], sizes = [8, 128], strides = [1, 1]} : vector<8x512xf32> to vector<8x128xf32>
      %67 = arith.negf %66 : vector<8x128xf32>
      %68 = math.exp %67 : vector<8x128xf32>
      %cst_43 = arith.constant 1.000000e+00 : f32
      %69 = vector.broadcast %cst_43 : f32 to vector<8x128xf32>
      %70 = arith.addf %69, %68 : vector<8x128xf32>
      %71 = arith.divf %69, %70 : vector<8x128xf32>
      %72 = arith.mulf %63, %arg17 : vector<8x128xf32>
      %73 = arith.mulf %57, %65 : vector<8x128xf32>
      %74 = arith.addf %72, %73 : vector<8x128xf32>
      %75 = math.tanh %74 : vector<8x128xf32>
      %76 = arith.mulf %71, %75 : vector<8x128xf32>
      %77 = vector.broadcast %arg15 : i32 to vector<8x1xi32>
      %78 = arith.cmpi slt, %77, %2 : vector<8x1xi32>
      %79 = vector.shape_cast %78 : vector<8x1xi1> to vector<8x1xi1>
      %80 = vector.broadcast %79 : vector<8x1xi1> to vector<8x128xi1>
      %81 = arith.select %80, %76, %arg16 : vector<8x128xi1>, vector<8x128xf32>
      %82 = vector.shape_cast %78 : vector<8x1xi1> to vector<8x1xi1>
      %83 = vector.broadcast %82 : vector<8x1xi1> to vector<8x128xi1>
      %84 = arith.select %83, %74, %arg17 : vector<8x128xi1>, vector<8x128xf32>
      scf.yield %81, %84 : vector<8x128xf32>, vector<8x128xf32>
    }
    %c0_28 = arith.constant 0 : index
    %c0_29 = arith.constant 0 : index
    %31 = vector.load %arg10[%c0_28, %c0_29] : memref<1x128xf32, #tpu.memory_space<vmem>>, vector<1x128xf32>
    %32 = vector.broadcast %31 : vector<1x128xf32> to vector<8x128xf32>
    %33 = arith.mulf %30#0, %32 : vector<8x128xf32>
    %cst_30 = arith.constant dense<0.000000e+00> : vector<8xf32>
    %34 = vector.multi_reduction <add>, %33, %cst_30 [1] : vector<8x128xf32> to vector<8xf32>
    %35 = vector.shape_cast %34 : vector<8xf32> to vector<8x1xf32>
    %c0_31 = arith.constant 0 : index
    %c0_32 = arith.constant 0 : index
    %36 = vector.load %arg11[%c0_31, %c0_32] : memref<1x1xf32, #tpu.memory_space<vmem>>, vector<1x1xf32>
    %37 = vector.broadcast %36 : vector<1x1xf32> to vector<8x1xf32>
    %38 = arith.addf %35, %37 : vector<8x1xf32>
    %39 = arith.negf %38 : vector<8x1xf32>
    %40 = math.exp %39 : vector<8x1xf32>
    %cst_33 = arith.constant 1.000000e+00 : f32
    %41 = vector.broadcast %cst_33 : f32 to vector<8x1xf32>
    %42 = arith.addf %41, %40 : vector<8x1xf32>
    %43 = arith.divf %41, %42 : vector<8x1xf32>
    %c0_34 = arith.constant 0 : index
    %c0_35 = arith.constant 0 : index
    %44 = vector.load %arg12[%c0_34, %c0_35] : memref<8x1xf32, #tpu.memory_space<vmem>>, vector<8x1xf32>
    tpu.vector_store %arg12[%c0_34, %c0_35], %43 {strides = array<i32>} : memref<8x1xf32, #tpu.memory_space<vmem>>, vector<8x1xf32>,
    return
  }
  func.func @transform_0(%arg0: i32, %arg1: memref<1xi32, #tpu.memory_space<smem>>) -> (i32, i32, i32) {
    %c0_i32 = arith.constant 0 : i32
    %c0_i32_0 = arith.constant 0 : i32
    %c0_i32_1 = arith.constant 0 : i32
    return %c0_i32, %arg0, %c0_i32_0 : i32, i32, i32
  }
  func.func @transform_1(%arg0: i32, %arg1: memref<1xi32, #tpu.memory_space<smem>>) -> (i32, i32) {
    %c0_i32 = arith.constant 0 : i32
    %c0_i32_0 = arith.constant 0 : i32
    return %arg0, %c0_i32 : i32, i32
  }
  func.func @transform_2(%arg0: i32, %arg1: memref<1xi32, #tpu.memory_space<smem>>) -> (i32, i32) {
    %c0_i32 = arith.constant 0 : i32
    %c0_i32_0 = arith.constant 0 : i32
    %c0_i32_1 = arith.constant 0 : i32
    return %c0_i32, %c0_i32_0 : i32, i32
  }
  func.func @transform_3(%arg0: i32, %arg1: memref<1xi32, #tpu.memory_space<smem>>) -> (i32, i32) {
    %c0_i32 = arith.constant 0 : i32
    %c0_i32_0 = arith.constant 0 : i32
    %c0_i32_1 = arith.constant 0 : i32
    return %c0_i32, %c0_i32_0 : i32, i32
  }
  func.func @transform_4(%arg0: i32, %arg1: memref<1xi32, #tpu.memory_space<smem>>) -> (i32, i32) {
    %c0_i32 = arith.constant 0 : i32
    %c0_i32_0 = arith.constant 0 : i32
    %c0_i32_1 = arith.constant 0 : i32
    return %c0_i32, %c0_i32_0 : i32, i32
  }
  func.func @transform_5(%arg0: i32, %arg1: memref<1xi32, #tpu.memory_space<smem>>) -> (i32, i32) {
    %c0_i32 = arith.constant 0 : i32
    %c0_i32_0 = arith.constant 0 : i32
    %c0_i32_1 = arith.constant 0 : i32
    return %c0_i32, %c0_i32_0 : i32, i32
  }
  func.func @transform_6(%arg0: i32, %arg1: memref<1xi32, #tpu.memory_space<smem>>) -> (i32, i32) {
    %c0_i32 = arith.constant 0 : i32
    %c0_i32_0 = arith.constant 0 : i32
    %c0_i32_1 = arith.constant 0 : i32
    return %c0_i32, %c0_i32_0 : i32, i32
  }
  func.func @transform_7(%arg0: i32, %arg1: memref<1xi32, #tpu.memory_space<smem>>) -> (i32, i32) {
    %c0_i32 = arith.constant 0 : i32
    %c0_i32_0 = arith.constant 0 : i32
    %c0_i32_1 = arith.constant 0 : i32
    return %c0_i32, %c0_i32_0 : i32, i32
  }
  func.func @transform_8(%arg0: i32, %arg1: memref<1xi32, #tpu.memory_space<smem>>) -> (i32, i32) {
    %c0_i32 = arith.constant 0 : i32
    %c0_i32_0 = arith.constant 0 : i32
    %c0_i32_1 = arith.constant 0 : i32
    return %c0_i32, %c0_i32_0 : i32, i32
  }
  func.func @transform_9(%arg0: i32, %arg1: memref<1xi32, #tpu.memory_space<smem>>) -> (i32, i32) {
    %c0_i32 = arith.constant 0 : i32
    %c0_i32_0 = arith.constant 0 : i32
    %c0_i32_1 = arith.constant 0 : i32
    return %c0_i32, %c0_i32_0 : i32, i32
  }
  func.func @transform_10(%arg0: i32, %arg1: memref<1xi32, #tpu.memory_space<smem>>) -> (i32, i32) {
    %c0_i32 = arith.constant 0 : i32
    %c0_i32_0 = arith.constant 0 : i32
    return %arg0, %c0_i32 : i32, i32
  }
}

</mosaic_0001>

<bundles_post_ra>
// kernel: tpu_custom_call.1
= control target key start
LH: loop header
LB: loop body
LE: loop exit
PB: predicated region body
PF: predicated region fallthrough
CT: control target
= control target key end

     0   :  { %s2674_s0 = inlined_call_operand.<no memory space> [shape: s32[1], index: 0, kind: input, shape index: {}]   ;;  %s2675_s1 = inlined_call_operand.hbm [shape: bf16[8,8,128], index: 1, kind: input, shape index: {}]   ;;  %s2676_s2 = inlined_call_operand.vmem [shape: s32[8,1], index: 2, kind: input, shape index: {}]   ;;  %s2677_s3 = inlined_call_operand.hbm [shape: bf16[128,512], index: 3, kind: input, shape index: {}]   ;;  %s2678_s4 = inlined_call_operand.hbm [shape: bf16[128,512], index: 4, kind: input, shape index: {}]   ;;  %s2679_s5 = inlined_call_operand.vmem [shape: f32[1,512], index: 5, kind: input, shape index: {}]   ;;  %s2680_s6 = inlined_call_operand.hbm [shape: bf16[128,512], index: 6, kind: input, shape index: {}]   ;;  %s2681_s7 = inlined_call_operand.hbm [shape: bf16[128,512], index: 7, kind: input, shape index: {}]   ;;  %s2682_s8 = inlined_call_operand.vmem [shape: f32[1,512], index: 8, kind: input, shape index: {}]   ;;  %s2683_s9 = inlined_call_operand.vmem [shape: f32[1,128], index: 9, kind: input, shape index: {}]   ;;  %s2684_s10 = inlined_call_operand.<no memory space> [shape: f32[1,1], index: 10, kind: input, shape index: {}]   ;;  %s2685_s11 = inlined_call_operand.vmem [shape: f32[8,1], index: 11, kind: output, shape index: {}]  }
   0x1   :  { %v17_v0 = vstv %s2684_s10 }
   0x2   :  { %18 = vst [vmem:[#allocation6] sm:$0x1] %v17_v0 }
   0x3   :  { %19 = vsyncpa [#allocation8], 0 }
   0x4   :  { %20 = vsyncpa [#allocation10], 0 }
   0x5   :  { %21 = vsyncpa [#allocation13], 0  ;;  %s2309_s19 = smov [#allocation9]   ;;  %s2137_s23 = scalar_lea.hbm %s2677_s3, 4096 }
   0x6   :  { %s41_s20 = sshll.u32 %s2309_s19, 4  ;;  %p2138_p0 = scmp.ne.s32.totalorder %s2677_s3, %s2137_s23  ;;  %s42_s20 = int_to_ptr.vmem [resolvable:$true] %s41_s20 }
   0x7   :  { %p2141_p1 = scmp.lt.u32.totalorder %s2137_s23, %s2677_s3 }
   0x9   :  { %p2143_p2 = pnand %p2141_p1, %p2138_p0 }
   0xb   :  { %2146 = shalt.err (!%p2143_p2)
}
   0xc   :  { %s2147_s10 = scalar_lea.vmem %s42_s20, 4096  ;;  %p2152_p4 = scmp.lt.s32.totalorder %s42_s20, %s42_s20 }
   0xd   :  { %p2148_p3 = scmp.ne.s32.totalorder %s42_s20, %s2147_s10  ;;  %p2153_p5 = scmp.lt.s32.totalorder %s2147_s10, %s2147_s10 }
   0xf   :  { %p2154_p6 = por %p2153_p5, %p2152_p4 }
  0x11   :  { %p2155_p7 = pnand %p2154_p6, %p2148_p3 }
  0x13   :  { %2158 = shalt.err (!%p2155_p7)
}
  0x14   :  { %s2310_s28 = smov 256   ;;  %s2311_s29 = smov 16  }
  0x15   :  { %47 = dma.hbm_to_vmem [thread:$0]  %s2677_s3, 4096, %s42_s20, [#allocation10], %s2310_s28, %s2310_s28, %s2311_s29  }
  0x16   :  { %s2312_s13 = smov [#allocation12]   ;;  %s2313_s15 = smov [#allocation7]  }
  0x17   :  { %s67_s14 = sshll.u32 %s2312_s13, 4  ;;  %s27_s16 = sshll.u32 %s2313_s15, 4  ;;  %s68_s14 = int_to_ptr.vmem [resolvable:$true] %s67_s14  ;;  %s28_s16 = int_to_ptr.vmem [resolvable:$true] %s27_s16 }
  0x18   :  { %s2159_s19 = scalar_lea.hbm %s2680_s6, 4096 }
  0x19   :  { %p2160_p8 = scmp.ne.s32.totalorder %s2680_s6, %s2159_s19  ;;  %p2163_p9 = scmp.lt.u32.totalorder %s2159_s19, %s2680_s6 }
  0x1b   :  { %p2165_p10 = pnand %p2163_p9, %p2160_p8 }
  0x1d   :  { %2168 = shalt.err (!%p2165_p10)
}
  0x1e   :  { %s2169_s3 = scalar_lea.vmem %s68_s14, 4096  ;;  %p2174_p12 = scmp.lt.s32.totalorder %s68_s14, %s68_s14 }
  0x1f   :  { %p2170_p11 = scmp.ne.s32.totalorder %s68_s14, %s2169_s3  ;;  %p2175_p13 = scmp.lt.s32.totalorder %s2169_s3, %s2169_s3 }
  0x21   :  { %p2176_p0 = por %p2175_p13, %p2174_p12 }
  0x23   :  { %p2177_p1 = pnand %p2176_p0, %p2170_p11 }
  0x25   :  { %2180 = shalt.err (!%p2177_p1)
}
  0x26   :  { %73 = dma.hbm_to_vmem [thread:$0]  %s2680_s6, 4096, %s68_s14, [#allocation13], %s2310_s28, %s2310_s28, %s2311_s29  }
  0x27   :  { %s2181_s10 = scalar_lea.hbm %s2675_s1, 512 }
  0x28   :  { %p2182_p2 = scmp.ne.s32.totalorder %s2675_s1, %s2181_s10  ;;  %p2185_p3 = scmp.lt.u32.totalorder %s2181_s10, %s2675_s1 }
  0x2a   :  { %p2187_p4 = pnand %p2185_p3, %p2182_p2 }
  0x2c   :  { %2190 = shalt.err (!%p2187_p4)
}
  0x2d   :  { %s2191_s17 = scalar_lea.vmem %s28_s16, 512  ;;  %p2196_p6 = scmp.lt.s32.totalorder %s28_s16, %s28_s16 }
  0x2e   :  { %p2192_p5 = scmp.ne.s32.totalorder %s28_s16, %s2191_s17  ;;  %p2197_p7 = scmp.lt.s32.totalorder %s2191_s17, %s2191_s17 }
  0x30   :  { %p2198_p8 = por %p2197_p7, %p2196_p6 }
  0x32   :  { %p2199_p9 = pnand %p2198_p8, %p2192_p5 }
  0x34   :  { %2202 = shalt.err (!%p2199_p9)
}
  0x35   :  { %s2314_s6 = smov 64   ;;  %s2315_s14 = smov 4  }
  0x36   :  { %33 = dma.hbm_to_vmem [thread:$0]  %s2675_s1, 512, %s28_s16, [#allocation8], %s2314_s6, %s2314_s6, %s2315_s14  }
  0x37   :  { %s2316_s21 = smov [#allocation11]   ;;  %s2317_s23 = smov [#allocation14]  }
  0x38   :  { %s53_s22 = sshll.u32 %s2316_s21, 4  ;;  %s79_s24 = sshll.u32 %s2317_s23, 4  ;;  %s54_s22 = int_to_ptr.vmem [resolvable:$true] %s53_s22  ;;  %s80_s24 = int_to_ptr.vmem [resolvable:$true] %s79_s24 }
  0x39   :  { %s2203_s25 = scalar_lea.hbm %s2678_s4, 4096 }
  0x3a   :  { %p2204_p10 = scmp.ne.s32.totalorder %s2678_s4, %s2203_s25  ;;  %p2207_p11 = scmp.lt.u32.totalorder %s2203_s25, %s2678_s4 }
  0x3c   :  { %p2209_p12 = pnand %p2207_p11, %p2204_p10 }
  0x3e   :  { %2212 = shalt.err (!%p2209_p12)
}
  0x3f   :  { %s2213_s1 = scalar_lea.vmem %s54_s22, 4096  ;;  %p2218_p0 = scmp.lt.s32.totalorder %s54_s22, %s54_s22 }
  0x40   :  { %p2214_p13 = scmp.ne.s32.totalorder %s54_s22, %s2213_s1  ;;  %p2219_p1 = scmp.lt.s32.totalorder %s2213_s1, %s2213_s1 }
  0x42   :  { %p2220_p2 = por %p2219_p1, %p2218_p0 }
  0x44   :  { %p2221_p3 = pnand %p2220_p2, %p2214_p13 }
  0x46   :  { %2224 = shalt.err (!%p2221_p3)
}
  0x47   :  { %59 = dma.hbm_to_vmem [thread:$0]  %s2678_s4, 4096, %s54_s22, [#allocation10], %s2310_s28, %s2310_s28, %s2311_s29  }
  0x48   :  { %s2225_s17 = scalar_lea.hbm %s2681_s7, 4096 }
  0x49   :  { %p2226_p4 = scmp.ne.s32.totalorder %s2681_s7, %s2225_s17  ;;  %p2229_p5 = scmp.lt.u32.totalorder %s2225_s17, %s2681_s7 }
  0x4b   :  { %p2231_p6 = pnand %p2229_p5, %p2226_p4 }
  0x4d   :  { %2234 = shalt.err (!%p2231_p6)
}
  0x4e   :  { %s2235_s21 = scalar_lea.vmem %s80_s24, 4096  ;;  %p2240_p8 = scmp.lt.s32.totalorder %s80_s24, %s80_s24 }
  0x4f   :  { %p2236_p7 = scmp.ne.s32.totalorder %s80_s24, %s2235_s21  ;;  %p2241_p9 = scmp.lt.s32.totalorder %s2235_s21, %s2235_s21 }
  0x51   :  { %p2242_p10 = por %p2241_p9, %p2240_p8 }
  0x53   :  { %p2243_p11 = pnand %p2242_p10, %p2236_p7 }
  0x55   :  { %2246 = shalt.err (!%p2243_p11)
}
  0x56   :  { %85 = dma.hbm_to_vmem [thread:$0]  %s2681_s7, 4096, %s80_s24, [#allocation13], %s2310_s28, %s2310_s28, %s2311_s29  }
  0x57   :  { %2275 = dma.done.wait [#allocation8], 512  }
  0x58   :  { %2276 = vsyncadd [#allocation8], 4294966784 }
  0x59   :  { %2277 = dma.done.wait [#allocation10], 8192  }
  0x5a   :  { %2278 = vsyncadd [#allocation10], 4294959104 }
  0x5b   :  { %2279 = dma.done.wait [#allocation13], 8192  }
  0x5c   :  { %2280 = vsyncadd [#allocation13], 4294959104  ;;  %v2318_v1 = vmov 0   ;;  %v2461_v2 = vld [vmem:[%s2676_s2] sm:$0xff]  ;;  %v1904_v6 = vld [vmem:[#allocation9 + $0x8] ss:$16 sps:$4 sm:$0xff]   ;;  %v152_v39 = vlaneseq }
  0x5d   :  { %388 = vmatprep.mubr.bf16.mxu0 %v2318_v1  ;;  %461 = vmatprep.mubr.bf16.mxu1 %v2318_v1  ;;  %v1899_v3 = vld [vmem:[#allocation9 + $0x4] ss:$16 sps:$4 sm:$0xff]   ;;  %v1901_v4 = vld [vmem:[#allocation9 + $0xc] ss:$16 sps:$4 sm:$0xff]   ;;  %v1903_v5 = vld [vmem:[#allocation9] ss:$16 sps:$4 sm:$0xff]  }
  0x5e   :  { %356 = vmatprep.subr.bf16.mxu0 %v1899_v3  ;;  %v1905_v7 = vld [vmem:[#allocation9 + $0x24] ss:$16 sps:$4 sm:$0xff]   ;;  %429 = vmatprep.subr.bf16.mxu1 %v1901_v4  ;;  %v1907_v8 = vld [vmem:[#allocation9 + $0x2c] ss:$16 sps:$4 sm:$0xff]   ;;  %v1909_v9 = vld [vmem:[#allocation9 + $0x20] ss:$16 sps:$4 sm:$0xff]  }
  0x5f   :  { %357 = vmatpush1.bf16.msra.mxu0 %v1903_v5  ;;  %430 = vmatpush1.bf16.msra.mxu1 %v1904_v6  ;;  %v1910_v10 = vld [vmem:[#allocation9 + $0x28] ss:$16 sps:$4 sm:$0xff]   ;;  %v1911_v11 = vld [vmem:[#allocation9 + $0x44] ss:$16 sps:$4 sm:$0xff]   ;;  %v1913_v12 = vld [vmem:[#allocation9 + $0x4c] ss:$16 sps:$4 sm:$0xff]  }
  0x60   :  { %358 = vmatprep.subr.bf16.mxu0 %v1905_v7  ;;  %431 = vmatprep.subr.bf16.mxu1 %v1907_v8  ;;  %v1915_v13 = vld [vmem:[#allocation9 + $0x40] ss:$16 sps:$4 sm:$0xff]   ;;  %v1916_v14 = vld [vmem:[#allocation9 + $0x48] ss:$16 sps:$4 sm:$0xff]   ;;  %v1917_v15 = vld [vmem:[#allocation9 + $0x64] ss:$16 sps:$4 sm:$0xff]  }
  0x61   :  { %v1919_v16 = vld [vmem:[#allocation9 + $0x6c] ss:$16 sps:$4 sm:$0xff]   ;;  %v1921_v17 = vld [vmem:[#allocation9 + $0x60] ss:$16 sps:$4 sm:$0xff]   ;;  %v1922_v18 = vld [vmem:[#allocation9 + $0x68] ss:$16 sps:$4 sm:$0xff]  }
  0x62   :  { %v1923_v19 = vld [vmem:[#allocation9 + $0x84] ss:$16 sps:$4 sm:$0xff]   ;;  %v1925_v20 = vld [vmem:[#allocation9 + $0x8c] ss:$16 sps:$4 sm:$0xff]   ;;  %v1927_v21 = vld [vmem:[#allocation9 + $0x80] ss:$16 sps:$4 sm:$0xff]  }
  0x63   :  { %359 = vmatpush1.bf16.msra.mxu0 %v1909_v9  ;;  %432 = vmatpush1.bf16.msra.mxu1 %v1910_v10  ;;  %v1928_v22 = vld [vmem:[#allocation9 + $0x88] ss:$16 sps:$4 sm:$0xff]   ;;  %v1929_v23 = vld [vmem:[#allocation9 + $0xa4] ss:$16 sps:$4 sm:$0xff]   ;;  %v1931_v24 = vld [vmem:[#allocation9 + $0xac] ss:$16 sps:$4 sm:$0xff]  }
  0x64   :  { %360 = vmatprep.subr.bf16.mxu0 %v1911_v11  ;;  %433 = vmatprep.subr.bf16.mxu1 %v1913_v12  ;;  %v1933_v25 = vld [vmem:[#allocation9 + $0xa0] ss:$16 sps:$4 sm:$0xff]   ;;  %v1934_v26 = vld [vmem:[#allocation9 + $0xa8] ss:$16 sps:$4 sm:$0xff]   ;;  %v1935_v27 = vld [vmem:[#allocation9 + $0xc4] ss:$16 sps:$4 sm:$0xff]  }
  0x65   :  { %v1937_v28 = vld [vmem:[#allocation9 + $0xcc] ss:$16 sps:$4 sm:$0xff]   ;;  %v1939_v29 = vld [vmem:[#allocation9 + $0xc0] ss:$16 sps:$4 sm:$0xff]   ;;  %v1940_v30 = vld [vmem:[#allocation9 + $0xc8] ss:$16 sps:$4 sm:$0xff]  }
  0x66   :  { %v1941_v31 = vld [vmem:[#allocation9 + $0xe4] ss:$16 sps:$4 sm:$0xff]   ;;  %v1943_v32 = vld [vmem:[#allocation9 + $0xec] ss:$16 sps:$4 sm:$0xff]   ;;  %v1945_v33 = vld [vmem:[#allocation9 + $0xe0] ss:$16 sps:$4 sm:$0xff]  }
  0x67   :  { %361 = vmatpush1.bf16.msra.mxu0 %v1915_v13  ;;  %434 = vmatpush1.bf16.msra.mxu1 %v1916_v14  ;;  %v1946_v34 = vld [vmem:[#allocation9 + $0xe8] ss:$16 sps:$4 sm:$0xff]   ;;  %v1947_v35 = vld [vmem:[#allocation7] sm:$0xff]   ;;  %v1949_v37 = vld [vmem:[#allocation7 + $0x10] sm:$0xff]   ;;  %v2469_v40 = vshrl.u32 %v152_v39, 7  ;;  %p1713_p12 = scmp.le.s32.totalorder %s2674_s0, 0 }
  0x68   :  { %362 = vmatprep.subr.bf16.mxu0 %v1917_v15  ;;  %435 = vmatprep.subr.bf16.mxu1 %v1919_v16  ;;  %v1948_v36 = vld [vmem:[#allocation7 + $0x8] sm:$0xff]   ;;  %v1950_v38 = vld [vmem:[#allocation7 + $0x18] sm:$0xff]   ;;  %s2537_s20 = smov (!%p1713_p12), 0  }
  0x69   :  { %v154_v41 = vsub.s32 0, %v2469_v40  ;;  %v110_v42 = vld [vmem:[%s2679_s5] sm:$0xf]  ;;  %v162_v43 = vsub.s32 2, %v2469_v40  ;;  %v158_v44 = vsub.s32 1, %v2469_v40  ;;  %v166_v45 = vsub.s32 3, %v2469_v40 }
  0x6b   :  { %363 = vmatpush1.bf16.msra.mxu0 %v1921_v17  ;;  %436 = vmatpush1.bf16.msra.mxu1 %v1922_v18  ;;  %v2480_v46 = vrot.slane %v110_v42, %v154_v41  ;;  %v2484_v47 = vrot.slane %v110_v42, %v162_v43  ;;  %v2488_v48 = vrot.slane %v110_v42, %v158_v44 }
  0x6c   :  { %364 = vmatprep.subr.bf16.mxu0 %v1923_v19  ;;  %437 = vmatprep.subr.bf16.mxu1 %v1925_v20  ;;  %v2492_v49 = vrot.slane %v110_v42, %v166_v45 }
  0x6f   :  { %365 = vmatpush1.bf16.msra.mxu0 %v1927_v21  ;;  %438 = vmatpush1.bf16.msra.mxu1 %v1928_v22 }
  0x70   :  { %366 = vmatprep.subr.bf16.mxu0 %v1929_v23  ;;  %439 = vmatprep.subr.bf16.mxu1 %v1931_v24 }
  0x73   :  { %367 = vmatpush1.bf16.msra.mxu0 %v1933_v25  ;;  %440 = vmatpush1.bf16.msra.mxu1 %v1934_v26 }
  0x74   :  { %368 = vmatprep.subr.bf16.mxu0 %v1935_v27  ;;  %441 = vmatprep.subr.bf16.mxu1 %v1937_v28 }
  0x77   :  { %369 = vmatpush1.bf16.msra.mxu0 %v1939_v29  ;;  %442 = vmatpush1.bf16.msra.mxu1 %v1940_v30 }
  0x78   :  { %370 = vmatprep.subr.bf16.mxu0 %v1941_v31  ;;  %443 = vmatprep.subr.bf16.mxu1 %v1943_v32 }
  0x7b   :  { %371 = vmatpush1.bf16.msra.mxu0 %v1945_v33  ;;  %444 = vmatpush1.bf16.msra.mxu1 %v1946_v34 }
  0x7e   :  { %389 = vmatmul.mubr.bf16.vlgmr.msra.gmra.mrb[0].mxu0 %v1947_v35  ;;  %462 = vmatmul.mubr.bf16.vlgmr.msra.gmra.mrb[0].mxu1 %v1947_v35 }
  0x7f   :  { %398 = vmatprep.mubr.bf16.mxu0 %v2318_v1  ;;  %471 = vmatprep.mubr.bf16.mxu1 %v2318_v1 }
  0x86   :  { %399 = vmatmul.mubr.bf16.gmra.mrb[4].mxu0 %v1948_v36  ;;  %472 = vmatmul.mubr.bf16.gmra.mrb[4].mxu1 %v1948_v36 }
  0x87   :  { %408 = vmatprep.mubr.bf16.mxu0 %v2318_v1  ;;  %481 = vmatprep.mubr.bf16.mxu1 %v2318_v1 }
  0x8e   :  { %409 = vmatmul.mubr.bf16.gmra.mrb[8].mxu0 %v1949_v37  ;;  %482 = vmatmul.mubr.bf16.gmra.mrb[8].mxu1 %v1949_v37 }
  0x8f   :  { %418 = vmatprep.mubr.bf16.mxu0 %v2318_v1  ;;  %491 = vmatprep.mubr.bf16.mxu1 %v2318_v1 }
  0x96   :  { %419 = vmatmul.mubr.bf16.gmra.mrb[12].mxu0 %v1950_v38  ;;  %492 = vmatmul.mubr.bf16.gmra.mrb[12].mxu1 %v1950_v38 }
 0x151   :  { %v390_v50 = vpop.f32.mrb[0].mxu0  ;;  %v463_v52 = vpop.f32.mrb[0].mxu1 }
 0x152   :  { %v391_v51 = vadd.f32 %v390_v50, %v2480_v46  ;;  %v392_v53 = vpop.f32.mrb[1].mxu0  ;;  %v464_v54 = vadd.f32 %v463_v52, %v2484_v47  ;;  %v465_v56 = vpop.f32.mrb[1].mxu1 }
 0x153   :  { %v393_v55 = vadd.f32 %v392_v53, %v2488_v48  ;;  %v394_v57 = vpop.f32.mrb[2].mxu0  ;;  %v466_v58 = vadd.f32 %v465_v56, %v2492_v49  ;;  %v467_v60 = vpop.f32.mrb[2].mxu1 }
 0x154   :  { %502 = vst [vmem:[#allocation2] sm:$0xff] %v391_v51  ;;  %v395_v59 = vadd.f32 %v394_v57, %v2480_v46  ;;  %v396_v61 = vpop.f32.mrb[3].mxu0  ;;  %504 = vst [vmem:[#allocation2 + $0x10] sm:$0xff] %v464_v54  ;;  %v468_v62 = vadd.f32 %v467_v60, %v2484_v47  ;;  %v469_v0 = vpop.f32.mrb[3].mxu1 }
 0x155   :  { %503 = vst [vmem:[#allocation2 + $0x8] sm:$0xff] %v393_v55  ;;  %v397_v63 = vadd.f32 %v396_v61, %v2488_v48  ;;  %505 = vst [vmem:[#allocation2 + $0x18] sm:$0xff] %v466_v58  ;;  %v470_v3 = vadd.f32 %v469_v0, %v2492_v49 }
 0x156   :  { %506 = vst [vmem:[#allocation2 + $0x20] sm:$0xff] %v395_v59  ;;  %508 = vst [vmem:[#allocation2 + $0x30] sm:$0xff] %v468_v62 }
 0x157   :  { %507 = vst [vmem:[#allocation2 + $0x28] sm:$0xff] %v397_v63  ;;  %509 = vst [vmem:[#allocation2 + $0x38] sm:$0xff] %v470_v3 }
 0x159   :  { %v400_v4 = vpop.f32.mrb[4].mxu0  ;;  %v473_v6 = vpop.f32.mrb[4].mxu1 }
 0x15a   :  { %v401_v5 = vadd.f32 %v400_v4, %v2480_v46  ;;  %v402_v7 = vpop.f32.mrb[5].mxu0  ;;  %v474_v8 = vadd.f32 %v473_v6, %v2484_v47  ;;  %v475_v10 = vpop.f32.mrb[5].mxu1 }
 0x15b   :  { %v403_v9 = vadd.f32 %v402_v7, %v2488_v48  ;;  %v404_v11 = vpop.f32.mrb[6].mxu0  ;;  %v476_v12 = vadd.f32 %v475_v10, %v2492_v49  ;;  %v477_v14 = vpop.f32.mrb[6].mxu1 }
 0x15c   :  { %510 = vst [vmem:[#allocation2 + $0x40] sm:$0xff] %v401_v5  ;;  %v405_v13 = vadd.f32 %v404_v11, %v2480_v46  ;;  %v406_v15 = vpop.f32.mrb[7].mxu0  ;;  %512 = vst [vmem:[#allocation2 + $0x50] sm:$0xff] %v474_v8  ;;  %v478_v16 = vadd.f32 %v477_v14, %v2484_v47  ;;  %v479_v18 = vpop.f32.mrb[7].mxu1 }
 0x15d   :  { %511 = vst [vmem:[#allocation2 + $0x48] sm:$0xff] %v403_v9  ;;  %v407_v17 = vadd.f32 %v406_v15, %v2488_v48  ;;  %513 = vst [vmem:[#allocation2 + $0x58] sm:$0xff] %v476_v12  ;;  %v480_v19 = vadd.f32 %v479_v18, %v2492_v49 }
 0x15e   :  { %514 = vst [vmem:[#allocation2 + $0x60] sm:$0xff] %v405_v13  ;;  %516 = vst [vmem:[#allocation2 + $0x70] sm:$0xff] %v478_v16 }
 0x15f   :  { %515 = vst [vmem:[#allocation2 + $0x68] sm:$0xff] %v407_v17  ;;  %517 = vst [vmem:[#allocation2 + $0x78] sm:$0xff] %v480_v19 }
 0x161   :  { %v410_v20 = vpop.f32.mrb[8].mxu0  ;;  %v483_v22 = vpop.f32.mrb[8].mxu1 }
 0x162   :  { %v411_v21 = vadd.f32 %v410_v20, %v2480_v46  ;;  %v412_v23 = vpop.f32.mrb[9].mxu0  ;;  %v484_v24 = vadd.f32 %v483_v22, %v2484_v47  ;;  %v485_v26 = vpop.f32.mrb[9].mxu1 }
 0x163   :  { %v413_v25 = vadd.f32 %v412_v23, %v2488_v48  ;;  %v414_v27 = vpop.f32.mrb[10].mxu0  ;;  %v486_v28 = vadd.f32 %v485_v26, %v2492_v49  ;;  %v487_v30 = vpop.f32.mrb[10].mxu1 }
 0x164   :  { %518 = vst [vmem:[#allocation2 + $0x80] sm:$0xff] %v411_v21  ;;  %v415_v29 = vadd.f32 %v414_v27, %v2480_v46  ;;  %v416_v31 = vpop.f32.mrb[11].mxu0  ;;  %520 = vst [vmem:[#allocation2 + $0x90] sm:$0xff] %v484_v24  ;;  %v488_v32 = vadd.f32 %v487_v30, %v2484_v47  ;;  %v489_v34 = vpop.f32.mrb[11].mxu1 }
 0x165   :  { %519 = vst [vmem:[#allocation2 + $0x88] sm:$0xff] %v413_v25  ;;  %v417_v33 = vadd.f32 %v416_v31, %v2488_v48  ;;  %521 = vst [vmem:[#allocation2 + $0x98] sm:$0xff] %v486_v28  ;;  %v490_v35 = vadd.f32 %v489_v34, %v2492_v49 }
 0x166   :  { %522 = vst [vmem:[#allocation2 + $0xa0] sm:$0xff] %v415_v29  ;;  %524 = vst [vmem:[#allocation2 + $0xb0] sm:$0xff] %v488_v32 }
 0x167   :  { %523 = vst [vmem:[#allocation2 + $0xa8] sm:$0xff] %v417_v33  ;;  %525 = vst [vmem:[#allocation2 + $0xb8] sm:$0xff] %v490_v35 }
 0x169   :  { %v420_v36 = vpop.f32.mrb[12].mxu0  ;;  %v493_v38 = vpop.f32.mrb[12].mxu1  ;;  %1659 = sbr.rel (%p1713_p12) target bundleno = 664 (0x298), region = 91 }
 0x16a   :  { %v421_v37 = vadd.f32 %v420_v36, %v2480_v46  ;;  %v422_v39 = vpop.f32.mrb[13].mxu0  ;;  %v494_v42 = vadd.f32 %v493_v38, %v2484_v47  ;;  %v495_v51 = vpop.f32.mrb[13].mxu1 }
 0x16b   :  { %v423_v50 = vadd.f32 %v422_v39, %v2488_v48  ;;  %v424_v52 = vpop.f32.mrb[14].mxu0  ;;  %v496_v53 = vadd.f32 %v495_v51, %v2492_v49  ;;  %v497_v55 = vpop.f32.mrb[14].mxu1 }
 0x16c   :  { %526 = vst [vmem:[#allocation2 + $0xc0] sm:$0xff] %v421_v37  ;;  %v425_v54 = vadd.f32 %v424_v52, %v2480_v46  ;;  %v426_v56 = vpop.f32.mrb[15].mxu0  ;;  %528 = vst [vmem:[#allocation2 + $0xd0] sm:$0xff] %v494_v42  ;;  %v498_v57 = vadd.f32 %v497_v55, %v2484_v47  ;;  %v499_v59 = vpop.f32.mrb[15].mxu1  ;;  %v2533_v46 = vmov (!%p1713_p12), 0.0   ;;  %v2535_v47 = vmov (!%p1713_p12), 0.0  }
 0x16d   :  { %527 = vst [vmem:[#allocation2 + $0xc8] sm:$0xff] %v423_v50  ;;  %v427_v58 = vadd.f32 %v426_v56, %v2488_v48  ;;  %529 = vst [vmem:[#allocation2 + $0xd8] sm:$0xff] %v496_v53  ;;  %v500_v60 = vadd.f32 %v499_v59, %v2492_v49 }
 0x16e   :  { %530 = vst [vmem:[#allocation2 + $0xe0] sm:$0xff] %v425_v54  ;;  %532 = vst [vmem:[#allocation2 + $0xf0] sm:$0xff] %v498_v57 }
 0x16f   :  { %531 = vst [vmem:[#allocation2 + $0xe8] sm:$0xff] %v427_v58  ;;  %533 = vst [vmem:[#allocation2 + $0xf8] sm:$0xff] %v500_v60 }
 0x170 LB: > { %v1952_v48 = vld [vmem:[#allocation11 + $0x4] ss:$16 sps:$4 sm:$0xff]   ;;  %v1954_v49 = vld [vmem:[#allocation11] ss:$16 sps:$4 sm:$0xff]   ;;  %v2319_v61 = vmov 0   ;;  %v852_v63 = vstv %s2291_s20  ;;  %v549_v31 = vpack.c.bf16 %v2287_v47, %v2287_v47  ;;  %s1829_s25 = sshll.u32 %s2291_s20, 5  ;;  %s2291_s20 = sphi %s2537_s20, %s537_s20   ;;  %v2287_v47 = vphi %v2535_v47, %v859_v47   ;;  %v2283_v46 = vphi %v2533_v46, %v860_v46  }
 0x171   : > { %774 = vmatprep.mubr.bf16.mxu0 %v2319_v61  ;;  %815 = vmatprep.mubr.bf16.mxu1 %v2319_v61  ;;  %v1955_v62 = vld [vmem:[#allocation11 + $0x24] ss:$16 sps:$4 sm:$0xff]   ;;  %v1957_v0 = vld [vmem:[#allocation11 + $0x20] ss:$16 sps:$4 sm:$0xff]   ;;  %vm853_vm0 = vcmp.lt.s32.totalorder %v852_v63, %v2461_v2  ;;  %v1963_v5 = vld [vmem:[#allocation11 + $0xc] ss:$16 sps:$4 sm:$0xff]  }
 0x172   : > { %742 = vmatprep.subr.bf16.mxu0 %v1952_v48  ;;  %1951 = vset.pattern.permute.xlu0 %v2319_v61  ;;  %v1958_v3 = vld [vmem:[#allocation11 + $0x44] ss:$16 sps:$4 sm:$0xff]   ;;  %v854_v4 = vsel %vm853_vm0, 1, %v2319_v61  ;;  %v1966_v6 = vld [vmem:[#allocation11 + $0x8] ss:$16 sps:$4 sm:$0xff]   ;;  %s544_s26 = scalar_lea.vmem [#allocation2], %s1829_s25 }
 0x173   : > { %743 = vmatpush1.bf16.msra.mxu0 %v1954_v49  ;;  %856 = vperm.xlu0 %1951, %v854_v4   ;;  %v1960_v7 = vld [vmem:[#allocation11 + $0x40] ss:$16 sps:$4 sm:$0xff]   ;;  %v1961_v8 = vld [vmem:[#allocation11 + $0x64] ss:$16 sps:$4 sm:$0xff]   ;;  %v1969_v9 = vld [vmem:[#allocation11 + $0x2c] ss:$16 sps:$4 sm:$0xff]  }
 0x174   : > { %744 = vmatprep.subr.bf16.mxu0 %v1955_v62  ;;  %783 = vmatprep.subr.bf16.mxu1 %v1963_v5  ;;  %v1972_v10 = vld [vmem:[#allocation11 + $0x28] ss:$16 sps:$4 sm:$0xff]   ;;  %v1965_v11 = vld [vmem:[#allocation11 + $0x60] ss:$16 sps:$4 sm:$0xff]   ;;  %v1967_v12 = vld [vmem:[#allocation11 + $0x84] ss:$16 sps:$4 sm:$0xff]  }
 0x175   : > { %784 = vmatpush1.bf16.msra.mxu1 %v1966_v6  ;;  %v1975_v13 = vld [vmem:[#allocation11 + $0x4c] ss:$16 sps:$4 sm:$0xff]   ;;  %v1978_v14 = vld [vmem:[#allocation11 + $0x48] ss:$16 sps:$4 sm:$0xff]   ;;  %v1971_v16 = vld [vmem:[#allocation11 + $0x80] ss:$16 sps:$4 sm:$0xff]  }
 0x176   : > { %785 = vmatprep.subr.bf16.mxu1 %v1969_v9  ;;  %v1981_v15 = vld [vmem:[#allocation11 + $0x6c] ss:$16 sps:$4 sm:$0xff]   ;;  %v1973_v17 = vld [vmem:[#allocation11 + $0xa4] ss:$16 sps:$4 sm:$0xff]   ;;  %v1984_v18 = vld [vmem:[#allocation11 + $0x68] ss:$16 sps:$4 sm:$0xff]  }
 0x177   : > { %745 = vmatpush1.bf16.msra.mxu0 %v1957_v0  ;;  %v1987_v19 = vld [vmem:[#allocation11 + $0x8c] ss:$16 sps:$4 sm:$0xff]   ;;  %v1977_v20 = vld [vmem:[#allocation11 + $0xa0] ss:$16 sps:$4 sm:$0xff]   ;;  %v1979_v21 = vld [vmem:[#allocation11 + $0xc4] ss:$16 sps:$4 sm:$0xff]  }
 0x178   : > { %746 = vmatprep.subr.bf16.mxu0 %v1958_v3  ;;  %v1990_v22 = vld [vmem:[#allocation11 + $0x88] ss:$16 sps:$4 sm:$0xff]   ;;  %v1991_v23 = vld [vmem:[#allocation11 + $0xac] ss:$16 sps:$4 sm:$0xff]   ;;  %v1983_v24 = vld [vmem:[#allocation11 + $0xc0] ss:$16 sps:$4 sm:$0xff]  }
 0x179   : > { %786 = vmatpush1.bf16.msra.mxu1 %v1972_v10  ;;  %v1985_v25 = vld [vmem:[#allocation11 + $0xe4] ss:$16 sps:$4 sm:$0xff]   ;;  %v1993_v26 = vld [vmem:[#allocation11 + $0xa8] ss:$16 sps:$4 sm:$0xff]   ;;  %v1994_v27 = vld [vmem:[#allocation11 + $0xcc] ss:$16 sps:$4 sm:$0xff]  }
 0x17a   : > { %787 = vmatprep.subr.bf16.mxu1 %v1975_v13  ;;  %v1989_v28 = vld [vmem:[#allocation11 + $0xe0] ss:$16 sps:$4 sm:$0xff]   ;;  %v1996_v29 = vld [vmem:[#allocation11 + $0xc8] ss:$16 sps:$4 sm:$0xff]   ;;  %v1997_v30 = vld [vmem:[#allocation11 + $0xec] ss:$16 sps:$4 sm:$0xff]  }
 0x17b   : > { %747 = vmatpush1.bf16.msra.mxu0 %v1960_v7  ;;  %v1999_v32 = vld [vmem:[#allocation11 + $0xe8] ss:$16 sps:$4 sm:$0xff]   ;;  %v545_v33 = vld [vmem:[%s544_s26] sm:$0xff]  ;;  %v547_v58 = vld [vmem:[%s544_s26 + $0x10] sm:$0xff]  ;;  %s1751_s27 = sshll.u32 %s2291_s20, 2  ;;  %s537_s20 = sadd.s32 1, %s2291_s20  }
 0x17c   : > { %748 = vmatprep.subr.bf16.mxu0 %v1961_v8  ;;  %v546_v34 = vld [vmem:[%s544_s26 + $0x8] sm:$0xff]  ;;  %v548_v52 = vld [vmem:[%s544_s26 + $0x18] sm:$0xff]  ;;  %s863_s10 = scalar_lea.vmem [#allocation3], %s1751_s27  ;;  %p536_p13 = scmp.ge.s32.totalorder %s537_s20, %s2674_s0 }
 0x17d   : > { %788 = vmatpush1.bf16.msra.mxu1 %v1978_v14 }
 0x17e   : > { %789 = vmatprep.subr.bf16.mxu1 %v1981_v15 }
 0x17f   : > { %749 = vmatpush1.bf16.msra.mxu0 %v1965_v11 }
 0x180   : > { %750 = vmatprep.subr.bf16.mxu0 %v1967_v12 }
 0x181   : > { %790 = vmatpush1.bf16.msra.mxu1 %v1984_v18 }
 0x182   : > { %791 = vmatprep.subr.bf16.mxu1 %v1987_v19 }
 0x183   : > { %751 = vmatpush1.bf16.msra.mxu0 %v1971_v16 }
 0x184   : > { %752 = vmatprep.subr.bf16.mxu0 %v1973_v17 }
 0x185   : > { %792 = vmatpush1.bf16.msra.mxu1 %v1990_v22 }
 0x186   : > { %793 = vmatprep.subr.bf16.mxu1 %v1991_v23 }
 0x187   : > { %753 = vmatpush1.bf16.msra.mxu0 %v1977_v20 }
 0x188   : > { %754 = vmatprep.subr.bf16.mxu0 %v1979_v21 }
 0x189   : > { %794 = vmatpush1.bf16.msra.mxu1 %v1993_v26 }
 0x18a   : > { %795 = vmatprep.subr.bf16.mxu1 %v1994_v27 }
 0x18b   : > { %755 = vmatpush1.bf16.msra.mxu0 %v1983_v24 }
 0x18c   : > { %756 = vmatprep.subr.bf16.mxu0 %v1985_v25 }
 0x18d   : > { %796 = vmatpush1.bf16.msra.mxu1 %v1996_v29 }
 0x18e   : > { %797 = vmatprep.subr.bf16.mxu1 %v1997_v30 }
 0x18f   : > { %757 = vmatpush1.bf16.msra.mxu0 %v1989_v28 }
 0x191   : > { %798 = vmatpush1.bf16.msra.mxu1 %v1999_v32 }
 0x192   : > { %775 = vmatmul.mubr.bf16.vlgmr.msra.gmra.mrb[0].mxu0 %v549_v31 }
 0x194   : > { %816 = vmatmul.mubr.bf16.vlgmr.msra.gmra.mrb[0].mxu1 %v549_v31 }
 0x1f2   : > { %v857_v5 = vpop.permute.xlu0 %856 }
 0x1f3   : > { %vm858_vm1 = vcmp.eq.s32.totalorder %v857_v5, 1 }
 0x265   : > { %v776_v35 = vpop.f32.mrb[0].mxu0 }
 0x266   : > { %v824_v36 = vadd.f32 %v776_v35, %v545_v33  ;;  %v778_v37 = vpop.f32.mrb[1].mxu0 }
 0x267   : > { %v825_v38 = vadd.f32 %v778_v37, %v546_v34  ;;  %v780_v39 = vpop.f32.mrb[2].mxu0  ;;  %v817_v53 = vpop.f32.mrb[0].mxu1 }
 0x268   : > { %v1748_v42 = vmul.f32 -1.442695, %v824_v36  ;;  %v781_v50 = vpop.f32.mrb[3].mxu0  ;;  %v819_v54 = vpop.f32.mrb[1].mxu1  ;;  %v826_v60 = vadd.f32 %v817_v53, %v547_v58 }
 0x269   : > { %v1749_v51 = vmul.f32 -1.442695, %v825_v38  ;;  %v827_v55 = vadd.f32 %v819_v54, %v548_v52  ;;  %v821_v56 = vpop.f32.mrb[2].mxu1 }
 0x26a   : > { %2000 = vpow2.f32 %v1748_v42  ;;  %v822_v57 = vpop.f32.mrb[3].mxu1 }
 0x26b   : > { %2002 = vpow2.f32 %v1749_v51  ;;  %v1750_v59 = vmul.f32 -1.442695, %v827_v55 }
 0x26d   : > { %2004 = vpow2.f32 %v1750_v59 }
 0x26e   : > { %2006 = vtanh.f32 %v826_v60 }
 0x274   : > { %v2001_v48 = vpop.eup %2000 }
 0x275   : > { %v2003_v49 = vpop.eup %2002  ;;  %v831_v61 = vadd.f32 1.0, %v2001_v48 }
 0x276   : > { %v837_v62 = vadd.f32 1.0, %v2003_v49 }
 0x277   : > { %2008 = vrcp.f32 %v831_v61  ;;  %v2005_v63 = vpop.eup %2004 }
 0x278   : > { %2010 = vrcp.f32 %v837_v62  ;;  %v2007_v0 = vpop.eup %2006  ;;  %v844_v4 = vadd.f32 1.0, %v2005_v63 }
 0x27a   : > { %2012 = vrcp.f32 %v844_v4 }
 0x281   : > { %v2009_v3 = vpop.eup %2008 }
 0x282   : > { %v2011_v6 = vpop.eup %2010  ;;  %v848_v7 = vmul.f32 %v2009_v3, %v2007_v0 }
 0x283   : > { %v847_v8 = vmul.f32 %v2283_v46, %v2011_v6 }
 0x284   : > { %v2013_v10 = vpop.eup %2012 }
 0x285   : > { %v849_v9 = vadd.f32 %v848_v7, %v847_v8 }
 0x287   : > { %2014 = vtanh.f32 %v849_v9  ;;  %v860_v46 = vsel %vm858_vm1, %v849_v9, %v2283_v46  }
 0x291   : > { %v2015_v11 = vpop.eup %2014  ;;  %539 = sbr.rel (!%p536_p13) target bundleno = 368 (0x170), region = 97 }
 0x292   : > { %v851_v12 = vmul.f32 %v2015_v11, %v2013_v10 }
 0x294   : > { %v859_v47 = vsel %vm858_vm1, %v851_v12, %v2287_v47  }
 0x295   : > { %v861_v13 = vpack.c.bf16 %v859_v47, %v859_v47 }
 0x297   : > { %864 = vst [vmem:[%s863_s10] sm:$0xf] %v861_v13 }
 0x298 PF:  { %v2016_v14 = vld [vmem:[#allocation12 + $0x4] ss:$16 sps:$4 sm:$0xff]   ;;  %1143 = vmatprep.mubr.bf16.mxu0 %v2318_v1  ;;  %1216 = vmatprep.mubr.bf16.mxu1 %v2318_v1  ;;  %v2018_v15 = vld [vmem:[#allocation12 + $0xc] ss:$16 sps:$4 sm:$0xff]   ;;  %v2020_v16 = vld [vmem:[#allocation12] ss:$16 sps:$4 sm:$0xff]  }
 0x299   :  { %1111 = vmatprep.subr.bf16.mxu0 %v2016_v14  ;;  %v2021_v17 = vld [vmem:[#allocation12 + $0x8] ss:$16 sps:$4 sm:$0xff]   ;;  %1184 = vmatprep.subr.bf16.mxu1 %v2018_v15  ;;  %v2022_v18 = vld [vmem:[#allocation12 + $0x24] ss:$16 sps:$4 sm:$0xff]   ;;  %v2024_v19 = vld [vmem:[#allocation12 + $0x2c] ss:$16 sps:$4 sm:$0xff]  }
 0x29a   :  { %1112 = vmatpush1.bf16.msra.mxu0 %v2020_v16  ;;  %1185 = vmatpush1.bf16.msra.mxu1 %v2021_v17  ;;  %v2026_v20 = vld [vmem:[#allocation12 + $0x20] ss:$16 sps:$4 sm:$0xff]   ;;  %v2027_v47 = vld [vmem:[#allocation12 + $0x28] ss:$16 sps:$4 sm:$0xff]   ;;  %v2028_v21 = vld [vmem:[#allocation12 + $0x44] ss:$16 sps:$4 sm:$0xff]  }
 0x29b   :  { %1113 = vmatprep.subr.bf16.mxu0 %v2022_v18  ;;  %1186 = vmatprep.subr.bf16.mxu1 %v2024_v19  ;;  %v2030_v46 = vld [vmem:[#allocation12 + $0x4c] ss:$16 sps:$4 sm:$0xff]   ;;  %v2032_v22 = vld [vmem:[#allocation12 + $0x40] ss:$16 sps:$4 sm:$0xff]   ;;  %v2033_v23 = vld [vmem:[#allocation12 + $0x48] ss:$16 sps:$4 sm:$0xff]  }
 0x29c   :  { %v2034_v24 = vld [vmem:[#allocation12 + $0x64] ss:$16 sps:$4 sm:$0xff]   ;;  %v2036_v25 = vld [vmem:[#allocation12 + $0x6c] ss:$16 sps:$4 sm:$0xff]   ;;  %v2038_v26 = vld [vmem:[#allocation12 + $0x60] ss:$16 sps:$4 sm:$0xff]  }
 0x29d   :  { %v2039_v27 = vld [vmem:[#allocation12 + $0x68] ss:$16 sps:$4 sm:$0xff]   ;;  %v2040_v28 = vld [vmem:[#allocation12 + $0x84] ss:$16 sps:$4 sm:$0xff]   ;;  %v2042_v29 = vld [vmem:[#allocation12 + $0x8c] ss:$16 sps:$4 sm:$0xff]  }
 0x29e   :  { %1114 = vmatpush1.bf16.msra.mxu0 %v2026_v20  ;;  %1187 = vmatpush1.bf16.msra.mxu1 %v2027_v47  ;;  %v2044_v30 = vld [vmem:[#allocation12 + $0x80] ss:$16 sps:$4 sm:$0xff]   ;;  %v2045_v31 = vld [vmem:[#allocation12 + $0x88] ss:$16 sps:$4 sm:$0xff]   ;;  %v2046_v32 = vld [vmem:[#allocation12 + $0xa4] ss:$16 sps:$4 sm:$0xff]  }
 0x29f   :  { %1115 = vmatprep.subr.bf16.mxu0 %v2028_v21  ;;  %1188 = vmatprep.subr.bf16.mxu1 %v2030_v46  ;;  %v2048_v33 = vld [vmem:[#allocation12 + $0xac] ss:$16 sps:$4 sm:$0xff]   ;;  %v2050_v34 = vld [vmem:[#allocation12 + $0xa0] ss:$16 sps:$4 sm:$0xff]   ;;  %v2051_v35 = vld [vmem:[#allocation12 + $0xa8] ss:$16 sps:$4 sm:$0xff]  }
 0x2a0   :  { %v2052_v36 = vld [vmem:[#allocation12 + $0xc4] ss:$16 sps:$4 sm:$0xff]   ;;  %v2054_v37 = vld [vmem:[#allocation12 + $0xcc] ss:$16 sps:$4 sm:$0xff]   ;;  %v2056_v38 = vld [vmem:[#allocation12 + $0xc0] ss:$16 sps:$4 sm:$0xff]  }
 0x2a1   :  { %v2057_v39 = vld [vmem:[#allocation12 + $0xc8] ss:$16 sps:$4 sm:$0xff]   ;;  %v2058_v42 = vld [vmem:[#allocation12 + $0xe4] ss:$16 sps:$4 sm:$0xff]   ;;  %v2060_v50 = vld [vmem:[#allocation12 + $0xec] ss:$16 sps:$4 sm:$0xff]  }
 0x2a2   :  { %1116 = vmatpush1.bf16.msra.mxu0 %v2032_v22  ;;  %1189 = vmatpush1.bf16.msra.mxu1 %v2033_v23  ;;  %v2062_v51 = vld [vmem:[#allocation12 + $0xe0] ss:$16 sps:$4 sm:$0xff]   ;;  %v2063_v52 = vld [vmem:[#allocation12 + $0xe8] ss:$16 sps:$4 sm:$0xff]   ;;  %s2636_s15 = smov (!%p1713_p12), 0  }
 0x2a3   :  { %1117 = vmatprep.subr.bf16.mxu0 %v2034_v24  ;;  %1190 = vmatprep.subr.bf16.mxu1 %v2036_v25  ;;  %v2064_v53 = vld [vmem:[#allocation3] sm:$0xff]   ;;  %v2065_v54 = vld [vmem:[#allocation3 + $0x8] sm:$0xff]   ;;  %v2066_v55 = vld [vmem:[#allocation3 + $0x10] sm:$0xff]  }
 0x2a4   :  { %v2067_v56 = vld [vmem:[#allocation3 + $0x18] sm:$0xff]   ;;  %v865_v57 = vld [vmem:[%s2682_s8] sm:$0xf] }
 0x2a5   :  { %v2580_v58 = vrot.slane %v865_v57, %v154_v41  ;;  %v2584_v59 = vrot.slane %v865_v57, %v162_v43  ;;  %v2588_v60 = vrot.slane %v865_v57, %v158_v44 }
 0x2a6   :  { %1118 = vmatpush1.bf16.msra.mxu0 %v2038_v26  ;;  %1191 = vmatpush1.bf16.msra.mxu1 %v2039_v27 }
 0x2a7   :  { %1119 = vmatprep.subr.bf16.mxu0 %v2040_v28  ;;  %1192 = vmatprep.subr.bf16.mxu1 %v2042_v29 }
 0x2aa   :  { %1120 = vmatpush1.bf16.msra.mxu0 %v2044_v30  ;;  %1193 = vmatpush1.bf16.msra.mxu1 %v2045_v31 }
 0x2ab   :  { %1121 = vmatprep.subr.bf16.mxu0 %v2046_v32  ;;  %1194 = vmatprep.subr.bf16.mxu1 %v2048_v33 }
 0x2ae   :  { %1122 = vmatpush1.bf16.msra.mxu0 %v2050_v34  ;;  %1195 = vmatpush1.bf16.msra.mxu1 %v2051_v35 }
 0x2af   :  { %1123 = vmatprep.subr.bf16.mxu0 %v2052_v36  ;;  %1196 = vmatprep.subr.bf16.mxu1 %v2054_v37 }
 0x2b2   :  { %1124 = vmatpush1.bf16.msra.mxu0 %v2056_v38  ;;  %1197 = vmatpush1.bf16.msra.mxu1 %v2057_v39 }
 0x2b3   :  { %1125 = vmatprep.subr.bf16.mxu0 %v2058_v42  ;;  %1198 = vmatprep.subr.bf16.mxu1 %v2060_v50 }
 0x2b6   :  { %1126 = vmatpush1.bf16.msra.mxu0 %v2062_v51  ;;  %1199 = vmatpush1.bf16.msra.mxu1 %v2063_v52 }
 0x2b9   :  { %1144 = vmatmul.mubr.bf16.vlgmr.msra.gmra.mrb[0].mxu0 %v2064_v53  ;;  %1217 = vmatmul.mubr.bf16.vlgmr.msra.gmra.mrb[0].mxu1 %v2064_v53 }
 0x2ba   :  { %1153 = vmatprep.mubr.bf16.mxu0 %v2318_v1  ;;  %1226 = vmatprep.mubr.bf16.mxu1 %v2318_v1 }
 0x2c1   :  { %1154 = vmatmul.mubr.bf16.gmra.mrb[4].mxu0 %v2065_v54  ;;  %1227 = vmatmul.mubr.bf16.gmra.mrb[4].mxu1 %v2065_v54 }
 0x2c2   :  { %1163 = vmatprep.mubr.bf16.mxu0 %v2318_v1  ;;  %1236 = vmatprep.mubr.bf16.mxu1 %v2318_v1 }
 0x2c9   :  { %1164 = vmatmul.mubr.bf16.gmra.mrb[8].mxu0 %v2066_v55  ;;  %1237 = vmatmul.mubr.bf16.gmra.mrb[8].mxu1 %v2066_v55 }
 0x2ca   :  { %1173 = vmatprep.mubr.bf16.mxu0 %v2318_v1  ;;  %1246 = vmatprep.mubr.bf16.mxu1 %v2318_v1  ;;  %v2592_v1 = vrot.slane %v865_v57, %v166_v45 }
 0x2d1   :  { %1174 = vmatmul.mubr.bf16.gmra.mrb[12].mxu0 %v2067_v56  ;;  %1247 = vmatmul.mubr.bf16.gmra.mrb[12].mxu1 %v2067_v56 }
 0x38c   :  { %v1145_v48 = vpop.f32.mrb[0].mxu0  ;;  %v1218_v49 = vpop.f32.mrb[0].mxu1 }
 0x38d   :  { %v1146_v61 = vadd.f32 %v1145_v48, %v2580_v58  ;;  %v1219_v62 = vadd.f32 %v1218_v49, %v2584_v59  ;;  %v1147_v41 = vpop.f32.mrb[1].mxu0  ;;  %v1220_v63 = vpop.f32.mrb[1].mxu1 }
 0x38e   :  { %v1148_v0 = vadd.f32 %v1147_v41, %v2588_v60  ;;  %v1221_v43 = vadd.f32 %v1220_v63, %v2592_v1  ;;  %v1149_v3 = vpop.f32.mrb[2].mxu0  ;;  %v1222_v4 = vpop.f32.mrb[2].mxu1  ;;  %v2626_v63 = vmov 0.0  }
 0x38f   :  { %1257 = vst [vmem:[#allocation2] sm:$0xff] %v1146_v61  ;;  %1259 = vst [vmem:[#allocation2 + $0x10] sm:$0xff] %v1219_v62  ;;  %v1150_v40 = vadd.f32 %v1149_v3, %v2580_v58  ;;  %v1223_v44 = vadd.f32 %v1222_v4, %v2584_v59  ;;  %v1151_v45 = vpop.f32.mrb[3].mxu0  ;;  %v1224_v5 = vpop.f32.mrb[3].mxu1 }
 0x390   :  { %1258 = vst [vmem:[#allocation2 + $0x8] sm:$0xff] %v1148_v0  ;;  %1260 = vst [vmem:[#allocation2 + $0x18] sm:$0xff] %v1221_v43  ;;  %v1152_v6 = vadd.f32 %v1151_v45, %v2588_v60  ;;  %v1225_v7 = vadd.f32 %v1224_v5, %v2592_v1 }
 0x391   :  { %1261 = vst [vmem:[#allocation2 + $0x20] sm:$0xff] %v1150_v40  ;;  %1263 = vst [vmem:[#allocation2 + $0x30] sm:$0xff] %v1223_v44 }
 0x392   :  { %1262 = vst [vmem:[#allocation2 + $0x28] sm:$0xff] %v1152_v6  ;;  %1264 = vst [vmem:[#allocation2 + $0x38] sm:$0xff] %v1225_v7 }
 0x394   :  { %v1155_v8 = vpop.f32.mrb[4].mxu0  ;;  %v1228_v9 = vpop.f32.mrb[4].mxu1 }
 0x395   :  { %v1156_v10 = vadd.f32 %v1155_v8, %v2580_v58  ;;  %v1229_v11 = vadd.f32 %v1228_v9, %v2584_v59  ;;  %v1157_v12 = vpop.f32.mrb[5].mxu0  ;;  %v1230_v13 = vpop.f32.mrb[5].mxu1 }
 0x396   :  { %v1158_v14 = vadd.f32 %v1157_v12, %v2588_v60  ;;  %v1231_v15 = vadd.f32 %v1230_v13, %v2592_v1  ;;  %v1159_v16 = vpop.f32.mrb[6].mxu0  ;;  %v1232_v17 = vpop.f32.mrb[6].mxu1 }
 0x397   :  { %1265 = vst [vmem:[#allocation2 + $0x40] sm:$0xff] %v1156_v10  ;;  %1267 = vst [vmem:[#allocation2 + $0x50] sm:$0xff] %v1229_v11  ;;  %v1160_v18 = vadd.f32 %v1159_v16, %v2580_v58  ;;  %v1233_v19 = vadd.f32 %v1232_v17, %v2584_v59  ;;  %v1161_v20 = vpop.f32.mrb[7].mxu0  ;;  %v1234_v47 = vpop.f32.mrb[7].mxu1 }
 0x398   :  { %1266 = vst [vmem:[#allocation2 + $0x48] sm:$0xff] %v1158_v14  ;;  %1268 = vst [vmem:[#allocation2 + $0x58] sm:$0xff] %v1231_v15  ;;  %v1162_v21 = vadd.f32 %v1161_v20, %v2588_v60  ;;  %v1235_v46 = vadd.f32 %v1234_v47, %v2592_v1 }
 0x399   :  { %1269 = vst [vmem:[#allocation2 + $0x60] sm:$0xff] %v1160_v18  ;;  %1271 = vst [vmem:[#allocation2 + $0x70] sm:$0xff] %v1233_v19 }
 0x39a   :  { %1270 = vst [vmem:[#allocation2 + $0x68] sm:$0xff] %v1162_v21  ;;  %1272 = vst [vmem:[#allocation2 + $0x78] sm:$0xff] %v1235_v46 }
 0x39c   :  { %v1165_v22 = vpop.f32.mrb[8].mxu0  ;;  %v1238_v23 = vpop.f32.mrb[8].mxu1 }
 0x39d   :  { %v1166_v24 = vadd.f32 %v1165_v22, %v2580_v58  ;;  %v1239_v25 = vadd.f32 %v1238_v23, %v2584_v59  ;;  %v1167_v26 = vpop.f32.mrb[9].mxu0  ;;  %v1240_v27 = vpop.f32.mrb[9].mxu1 }
 0x39e   :  { %v1168_v28 = vadd.f32 %v1167_v26, %v2588_v60  ;;  %v1241_v29 = vadd.f32 %v1240_v27, %v2592_v1  ;;  %v1169_v30 = vpop.f32.mrb[10].mxu0  ;;  %v1242_v31 = vpop.f32.mrb[10].mxu1 }
 0x39f   :  { %1273 = vst [vmem:[#allocation2 + $0x80] sm:$0xff] %v1166_v24  ;;  %1275 = vst [vmem:[#allocation2 + $0x90] sm:$0xff] %v1239_v25  ;;  %v1170_v32 = vadd.f32 %v1169_v30, %v2580_v58  ;;  %v1243_v33 = vadd.f32 %v1242_v31, %v2584_v59  ;;  %v1171_v34 = vpop.f32.mrb[11].mxu0  ;;  %v1244_v35 = vpop.f32.mrb[11].mxu1 }
 0x3a0   :  { %1274 = vst [vmem:[#allocation2 + $0x88] sm:$0xff] %v1168_v28  ;;  %1276 = vst [vmem:[#allocation2 + $0x98] sm:$0xff] %v1241_v29  ;;  %v1172_v36 = vadd.f32 %v1171_v34, %v2588_v60  ;;  %v1245_v37 = vadd.f32 %v1244_v35, %v2592_v1 }
 0x3a1   :  { %1277 = vst [vmem:[#allocation2 + $0xa0] sm:$0xff] %v1170_v32  ;;  %1279 = vst [vmem:[#allocation2 + $0xb0] sm:$0xff] %v1243_v33 }
 0x3a2   :  { %1278 = vst [vmem:[#allocation2 + $0xa8] sm:$0xff] %v1172_v36  ;;  %1280 = vst [vmem:[#allocation2 + $0xb8] sm:$0xff] %v1245_v37 }
 0x3a4   :  { %v1175_v38 = vpop.f32.mrb[12].mxu0  ;;  %v1248_v39 = vpop.f32.mrb[12].mxu1  ;;  %1670 = sbr.rel (%p1713_p12) target bundleno = 1233 (0x4d1), region = 102 }
 0x3a5   :  { %v1176_v42 = vadd.f32 %v1175_v38, %v2580_v58  ;;  %v1249_v50 = vadd.f32 %v1248_v39, %v2584_v59  ;;  %v1177_v51 = vpop.f32.mrb[13].mxu0  ;;  %v1250_v52 = vpop.f32.mrb[13].mxu1 }
 0x3a6   :  { %v1178_v53 = vadd.f32 %v1177_v51, %v2588_v60  ;;  %v1251_v54 = vadd.f32 %v1250_v52, %v2592_v1  ;;  %v1179_v55 = vpop.f32.mrb[14].mxu0  ;;  %v1252_v56 = vpop.f32.mrb[14].mxu1 }
 0x3a7   :  { %1281 = vst [vmem:[#allocation2 + $0xc0] sm:$0xff] %v1176_v42  ;;  %1283 = vst [vmem:[#allocation2 + $0xd0] sm:$0xff] %v1249_v50  ;;  %v1180_v57 = vadd.f32 %v1179_v55, %v2580_v58  ;;  %v1253_v48 = vadd.f32 %v1252_v56, %v2584_v59  ;;  %v1181_v49 = vpop.f32.mrb[15].mxu0  ;;  %v1254_v61 = vpop.f32.mrb[15].mxu1  ;;  %v2632_v58 = vmov (!%p1713_p12), 0.0   ;;  %v2634_v59 = vmov (!%p1713_p12), 0.0  }
 0x3a8   :  { %1282 = vst [vmem:[#allocation2 + $0xc8] sm:$0xff] %v1178_v53  ;;  %1284 = vst [vmem:[#allocation2 + $0xd8] sm:$0xff] %v1251_v54  ;;  %v1182_v62 = vadd.f32 %v1181_v49, %v2588_v60  ;;  %v1255_v41 = vadd.f32 %v1254_v61, %v2592_v1 }
 0x3a9   :  { %1285 = vst [vmem:[#allocation2 + $0xe0] sm:$0xff] %v1180_v57  ;;  %1287 = vst [vmem:[#allocation2 + $0xf0] sm:$0xff] %v1253_v48 }
 0x3aa   :  { %1286 = vst [vmem:[#allocation2 + $0xe8] sm:$0xff] %v1182_v62  ;;  %1288 = vst [vmem:[#allocation2 + $0xf8] sm:$0xff] %v1255_v41 }
 0x3ab LB: > { %v2069_v60 = vld [vmem:[#allocation14 + $0x4] ss:$16 sps:$4 sm:$0xff]   ;;  %v2071_v1 = vld [vmem:[#allocation14] ss:$16 sps:$4 sm:$0xff]   ;;  %v2320_v0 = vmov 0   ;;  %v1607_v3 = vstv %s2303_s15  ;;  %v1304_v28 = vpack.c.bf16 %v2299_v59, %v2299_v59  ;;  %s1830_s17 = sshll.u32 %s2303_s15, 5  ;;  %s2303_s15 = sphi %s2636_s15, %s1292_s15   ;;  %v2299_v59 = vphi %v2634_v59, %v2686_v59   ;;  %v2295_v58 = vphi %v2632_v58, %v1615_v58  }
 0x3ac   : > { %1529 = vmatprep.mubr.bf16.mxu0 %v2320_v0  ;;  %1570 = vmatprep.mubr.bf16.mxu1 %v2320_v0  ;;  %v2072_v43 = vld [vmem:[#allocation14 + $0x24] ss:$16 sps:$4 sm:$0xff]   ;;  %v2074_v4 = vld [vmem:[#allocation14 + $0x20] ss:$16 sps:$4 sm:$0xff]   ;;  %vm1608_vm2 = vcmp.lt.s32.totalorder %v1607_v3, %v2461_v2  ;;  %v2080_v45 = vld [vmem:[#allocation14 + $0xc] ss:$16 sps:$4 sm:$0xff]  }
 0x3ad   : > { %1497 = vmatprep.subr.bf16.mxu0 %v2069_v60  ;;  %2068 = vset.pattern.permute.xlu0 %v2320_v0  ;;  %v2075_v40 = vld [vmem:[#allocation14 + $0x44] ss:$16 sps:$4 sm:$0xff]   ;;  %v1609_v44 = vsel %vm1608_vm2, 1, %v2320_v0  ;;  %v2083_v5 = vld [vmem:[#allocation14 + $0x8] ss:$16 sps:$4 sm:$0xff]   ;;  %s1299_s6 = scalar_lea.vmem [#allocation2], %s1830_s17 }
 0x3ae   : > { %1498 = vmatpush1.bf16.msra.mxu0 %v2071_v1  ;;  %1611 = vperm.xlu0 %2068, %v1609_v44   ;;  %v2077_v6 = vld [vmem:[#allocation14 + $0x40] ss:$16 sps:$4 sm:$0xff]   ;;  %v2078_v7 = vld [vmem:[#allocation14 + $0x64] ss:$16 sps:$4 sm:$0xff]   ;;  %v2086_v8 = vld [vmem:[#allocation14 + $0x2c] ss:$16 sps:$4 sm:$0xff]  }
 0x3af   : > { %1499 = vmatprep.subr.bf16.mxu0 %v2072_v43  ;;  %1538 = vmatprep.subr.bf16.mxu1 %v2080_v45  ;;  %v2089_v9 = vld [vmem:[#allocation14 + $0x28] ss:$16 sps:$4 sm:$0xff]   ;;  %v2082_v10 = vld [vmem:[#allocation14 + $0x60] ss:$16 sps:$4 sm:$0xff]   ;;  %v2084_v11 = vld [vmem:[#allocation14 + $0x84] ss:$16 sps:$4 sm:$0xff]  }
 0x3b0   : > { %1539 = vmatpush1.bf16.msra.mxu1 %v2083_v5  ;;  %v2092_v12 = vld [vmem:[#allocation14 + $0x4c] ss:$16 sps:$4 sm:$0xff]   ;;  %v2095_v13 = vld [vmem:[#allocation14 + $0x48] ss:$16 sps:$4 sm:$0xff]   ;;  %v2088_v15 = vld [vmem:[#allocation14 + $0x80] ss:$16 sps:$4 sm:$0xff]  }
 0x3b1   : > { %1540 = vmatprep.subr.bf16.mxu1 %v2086_v8  ;;  %v2098_v14 = vld [vmem:[#allocation14 + $0x6c] ss:$16 sps:$4 sm:$0xff]   ;;  %v2090_v16 = vld [vmem:[#allocation14 + $0xa4] ss:$16 sps:$4 sm:$0xff]   ;;  %v2101_v17 = vld [vmem:[#allocation14 + $0x68] ss:$16 sps:$4 sm:$0xff]  }
 0x3b2   : > { %1500 = vmatpush1.bf16.msra.mxu0 %v2074_v4  ;;  %v2104_v18 = vld [vmem:[#allocation14 + $0x8c] ss:$16 sps:$4 sm:$0xff]   ;;  %v2094_v19 = vld [vmem:[#allocation14 + $0xa0] ss:$16 sps:$4 sm:$0xff]   ;;  %v2096_v20 = vld [vmem:[#allocation14 + $0xc4] ss:$16 sps:$4 sm:$0xff]  }
 0x3b3   : > { %1501 = vmatprep.subr.bf16.mxu0 %v2075_v40  ;;  %v2107_v47 = vld [vmem:[#allocation14 + $0x88] ss:$16 sps:$4 sm:$0xff]   ;;  %v2108_v21 = vld [vmem:[#allocation14 + $0xac] ss:$16 sps:$4 sm:$0xff]   ;;  %v2100_v46 = vld [vmem:[#allocation14 + $0xc0] ss:$16 sps:$4 sm:$0xff]  }
 0x3b4   : > { %1541 = vmatpush1.bf16.msra.mxu1 %v2089_v9  ;;  %v2102_v22 = vld [vmem:[#allocation14 + $0xe4] ss:$16 sps:$4 sm:$0xff]   ;;  %v2110_v23 = vld [vmem:[#allocation14 + $0xa8] ss:$16 sps:$4 sm:$0xff]   ;;  %v2111_v24 = vld [vmem:[#allocation14 + $0xcc] ss:$16 sps:$4 sm:$0xff]  }
 0x3b5   : > { %1542 = vmatprep.subr.bf16.mxu1 %v2092_v12  ;;  %v2106_v25 = vld [vmem:[#allocation14 + $0xe0] ss:$16 sps:$4 sm:$0xff]   ;;  %v2113_v26 = vld [vmem:[#allocation14 + $0xc8] ss:$16 sps:$4 sm:$0xff]   ;;  %v2114_v27 = vld [vmem:[#allocation14 + $0xec] ss:$16 sps:$4 sm:$0xff]  }
 0x3b6   : > { %1502 = vmatpush1.bf16.msra.mxu0 %v2077_v6  ;;  %v2116_v29 = vld [vmem:[#allocation14 + $0xe8] ss:$16 sps:$4 sm:$0xff]   ;;  %v1300_v30 = vld [vmem:[%s1299_s6] sm:$0xff]  ;;  %v1302_v39 = vld [vmem:[%s1299_s6 + $0x10] sm:$0xff]  ;;  %s1292_s15 = sadd.s32 1, %s2303_s15  }
 0x3b7   : > { %1503 = vmatprep.subr.bf16.mxu0 %v2078_v7  ;;  %v1301_v31 = vld [vmem:[%s1299_s6 + $0x8] sm:$0xff]  ;;  %v1303_v50 = vld [vmem:[%s1299_s6 + $0x18] sm:$0xff]  ;;  %p1291_p0 = scmp.ge.s32.totalorder %s1292_s15, %s2674_s0 }
 0x3b8   : > { %1543 = vmatpush1.bf16.msra.mxu1 %v2095_v13 }
 0x3b9   : > { %1544 = vmatprep.subr.bf16.mxu1 %v2098_v14 }
 0x3ba   : > { %1504 = vmatpush1.bf16.msra.mxu0 %v2082_v10 }
 0x3bb   : > { %1505 = vmatprep.subr.bf16.mxu0 %v2084_v11 }
 0x3bc   : > { %1545 = vmatpush1.bf16.msra.mxu1 %v2101_v17 }
 0x3bd   : > { %1546 = vmatprep.subr.bf16.mxu1 %v2104_v18 }
 0x3be   : > { %1506 = vmatpush1.bf16.msra.mxu0 %v2088_v15 }
 0x3bf   : > { %1507 = vmatprep.subr.bf16.mxu0 %v2090_v16 }
 0x3c0   : > { %1547 = vmatpush1.bf16.msra.mxu1 %v2107_v47 }
 0x3c1   : > { %1548 = vmatprep.subr.bf16.mxu1 %v2108_v21 }
 0x3c2   : > { %1508 = vmatpush1.bf16.msra.mxu0 %v2094_v19 }
 0x3c3   : > { %1509 = vmatprep.subr.bf16.mxu0 %v2096_v20 }
 0x3c4   : > { %1549 = vmatpush1.bf16.msra.mxu1 %v2110_v23 }
 0x3c5   : > { %1550 = vmatprep.subr.bf16.mxu1 %v2111_v24 }
 0x3c6   : > { %1510 = vmatpush1.bf16.msra.mxu0 %v2100_v46 }
 0x3c7   : > { %1511 = vmatprep.subr.bf16.mxu0 %v2102_v22 }
 0x3c8   : > { %1551 = vmatpush1.bf16.msra.mxu1 %v2113_v26 }
 0x3c9   : > { %1552 = vmatprep.subr.bf16.mxu1 %v2114_v27 }
 0x3ca   : > { %1512 = vmatpush1.bf16.msra.mxu0 %v2106_v25 }
 0x3cc   : > { %1553 = vmatpush1.bf16.msra.mxu1 %v2116_v29 }
 0x3cd   : > { %1530 = vmatmul.mubr.bf16.vlgmr.msra.gmra.mrb[0].mxu0 %v1304_v28 }
 0x3cf   : > { %1571 = vmatmul.mubr.bf16.vlgmr.msra.gmra.mrb[0].mxu1 %v1304_v28 }
 0x42d   : > { %v1612_v0 = vpop.permute.xlu0 %1611 }
 0x42e   : > { %vm1613_vm3 = vcmp.eq.s32.totalorder %v1612_v0, 1 }
 0x4a0   : > { %v1531_v32 = vpop.f32.mrb[0].mxu0 }
 0x4a1   : > { %v1579_v33 = vadd.f32 %v1531_v32, %v1300_v30  ;;  %v1533_v34 = vpop.f32.mrb[1].mxu0 }
 0x4a2   : > { %v1580_v35 = vadd.f32 %v1533_v34, %v1301_v31  ;;  %v1535_v36 = vpop.f32.mrb[2].mxu0  ;;  %v1572_v51 = vpop.f32.mrb[0].mxu1 }
 0x4a3   : > { %v1823_v37 = vmul.f32 -1.442695, %v1579_v33  ;;  %v1536_v38 = vpop.f32.mrb[3].mxu0  ;;  %v1581_v52 = vadd.f32 %v1572_v51, %v1302_v39  ;;  %v1574_v53 = vpop.f32.mrb[1].mxu1 }
 0x4a4   : > { %v1824_v42 = vmul.f32 -1.442695, %v1580_v35  ;;  %v1582_v54 = vadd.f32 %v1574_v53, %v1303_v50  ;;  %v1576_v55 = vpop.f32.mrb[2].mxu1 }
 0x4a5   : > { %2117 = vpow2.f32 %v1823_v37  ;;  %v1577_v56 = vpop.f32.mrb[3].mxu1 }
 0x4a6   : > { %2119 = vpow2.f32 %v1824_v42  ;;  %v1825_v57 = vmul.f32 -1.442695, %v1582_v54 }
 0x4a8   : > { %2121 = vpow2.f32 %v1825_v57 }
 0x4a9   : > { %2123 = vtanh.f32 %v1581_v52 }
 0x4af   : > { %v2118_v48 = vpop.eup %2117 }
 0x4b0   : > { %v2120_v49 = vpop.eup %2119  ;;  %v1586_v61 = vadd.f32 1.0, %v2118_v48 }
 0x4b1   : > { %v1592_v62 = vadd.f32 1.0, %v2120_v49 }
 0x4b2   : > { %2125 = vrcp.f32 %v1586_v61  ;;  %v2122_v41 = vpop.eup %2121 }
 0x4b3   : > { %2127 = vrcp.f32 %v1592_v62  ;;  %v2124_v63 = vpop.eup %2123  ;;  %v1599_v1 = vadd.f32 1.0, %v2122_v41 }
 0x4b5   : > { %2129 = vrcp.f32 %v1599_v1 }
 0x4bc   : > { %v2126_v60 = vpop.eup %2125 }
 0x4bd   : > { %v2128_v43 = vpop.eup %2127  ;;  %v1603_v3 = vmul.f32 %v2126_v60, %v2124_v63 }
 0x4be   : > { %v1602_v4 = vmul.f32 %v2295_v58, %v2128_v43 }
 0x4bf   : > { %v2130_v44 = vpop.eup %2129 }
 0x4c0   : > { %v1604_v40 = vadd.f32 %v1603_v3, %v1602_v4 }
 0x4c2   : > { %2131 = vtanh.f32 %v1604_v40  ;;  %v1615_v58 = vsel %vm1613_vm3, %v1604_v40, %v2295_v58  }
 0x4ca   :  { %1294 = sbr.rel (!%p1291_p0) target bundleno = 939 (0x3ab), region = 108 }
 0x4cc   : > { %v2132_v45 = vpop.eup %2131 }
 0x4cd   : > { %v1606_v5 = vmul.f32 %v2132_v45, %v2130_v44 }
 0x4cf   : > { %v1614_v6 = vsel %vm1613_vm3, %v1606_v5, %v2299_v59  }
 0x4d0   : > { %v2686_v59 = vmov %v1614_v6  ;;  %v2687_v63 = vmov (%p1291_p0), %v1614_v6 }
 0x4d1 PF:  { %v1826_v59 = vld [vmem:[%s2683_s9] ss:$0 sm:$0xff]  ;;  %vm1640_vm4 = vcmask 7168   ;;  %v2307_v63 = vphi %v2626_v63, %v2687_v63  }
 0x4d2   :  { %v1623_v7 = vmul.f32 %v2307_v63, %v1826_v59  ;;  %v1827_v8 = vld [vmem:[#allocation6] ss:$0 sm:$0xff] }
 0x4d4   :  { %1624 = vadd.xlane.f32.xlu0 %v1623_v7 }
 0x561   :  { %v1625_v9 = vpop.xlane.xlu0 %1624 }
 0x562   :  { %v1633_v10 = vadd.f32 %v1827_v8, %v1625_v9 }
 0x564   :  { %v1828_v11 = vmul.f32 -1.442695, %v1633_v10 }
 0x566   :  { %2133 = vpow2.f32 %v1828_v11 }
 0x570   :  { %v2134_v12 = vpop.eup %2133 }
 0x571   :  { %v1637_v13 = vadd.f32 1.0, %v2134_v12 }
 0x573   :  { %2135 = vrcp.f32 %v1637_v13 }
 0x57d   :  { %v2136_v2 = vpop.eup %2135 }
 0x57e   :  { %1641 = vst.msk [vmem:[%s2685_s11] sm:$0xff] %vm1640_vm4, %v2136_v2 }
 0x57f   :  { %1646 = vsyncpa [#allocation8], 1 }
 0x580   :  { %1647 = vsyncpa [#allocation10], 1 }
 0x581   :  { %1648 = vsyncpa [#allocation13], 1 }

</bundles_post_ra>
